<compile_context>
chip_gen: v5e
topology: v5e:2x2
jax: 0.10.0
libtpu: 0.0.40
codegen_flags: <defaults>
</compile_context>

<pallas_src>
import functools
import math

import jax
import jax.numpy as jnp
from jax import lax
from jax.experimental import pallas as pl
from jax.experimental.pallas import tpu as pltpu

LANE = 128
# Row pitch multiple of 16 keeps both f32 (8,128) and bf16 (16,128) vreg tiles
# aligned under the in-kernel reshapes.
ROW_PAD = 16


def _round_up(x, m):
    return ((x + m - 1) // m) * m


def _vmem_capacity_bytes():
    """Best-effort VMEM capacity (v7x: 64 MiB/TC vs 128 MiB on v5e/v6e)."""
    try:
        return int(pltpu.get_tpu_info().vmem_capacity_bytes)
    except Exception:
        return 64 * 2 ** 20  # conservative (v7x) fallback


def _pick_samples_per_step(n, rows_per_sample, bytes_per_sample, vmem_budget):
    """Samples packed per grid step.

    * pack enough rows (~1024) to amortize the ~0.35us/step overhead,
    * stay under a conservative VMEM budget (generation aware),
    * keep >=2 grid steps only when that still leaves >=256-row blocks, so
      v7x's two TensorCores both get work while v5e/v6e (single TC) pay at
      most one extra ~0.35us step.
    No divisibility requirement: the wrapper pads a partial last block.
    """
    nb = min(n, max(1, -(-1024 // max(1, rows_per_sample))))
    nb = max(1, min(nb, vmem_budget // max(1, bytes_per_sample)))
    if n >= 2 and -(-n // nb) < 2:
        half = -(-n // 2)
        if half * rows_per_sample >= 256:
            nb = half
    return nb


def _conv_ln_lrelu_kernel(x_ref, w_ref, b_ref, g_ref, bt_ref, o_ref, *,
                          rows_valid, c_out, eps=1e-5):
    """One grid step == `nb` batch samples, ONE fused MXU matmul.

    x_ref  : (nb, R, K)   bf16 im2col patches, K = round_up(KH*KW*Cin, 128)
    w_ref  : (K, C)       bf16 conv weights (zero padded)
    b_ref  : (1, C)       f32 conv bias (zero in padded channels)
    g_ref  : (R, C)       f32 LN gamma (zero outside valid rows/channels)
    bt_ref : (R, C)       f32 LN beta  (zero outside valid rows/channels)
    o_ref  : (nb, R, C)   bf16 (intermediate stages) / f32 (final stage)
    """
    nb, r, k = x_ref.shape
    c = o_ref.shape[-1]

    # ---- conv: single (nb*R, K) x (K, C) matmul on the MXU, f32 accumulate.
    lhs = x_ref[...].reshape(nb * r, k)            # tile-aligned reshape (R%16==0)
    acc = jnp.dot(lhs, w_ref[...], preferred_element_type=jnp.float32)
    y = acc + b_ref[...]                           # (nb*R, C)

    # Padded channels / padded K are exactly zero (zero-padded weights + bias),
    # so they drop out of the LN sums for free.  Row padding (if any) carries
    # the bias -> mask only in that case.
    if r > rows_valid:
        ridx = lax.broadcasted_iota(jnp.int32, (nb * r, c), 0) % r
        y = jnp.where(ridx < rows_valid, y, 0.0)

    # ---- fused LayerNorm([C,H,W]) stats in one pass: var = E[y^2] - mean^2.
    y3 = y.reshape(nb, r, c)
    inv_n = 1.0 / float(rows_valid * c_out)
    s1 = jnp.sum(jnp.sum(y3, axis=2, keepdims=True), axis=1, keepdims=True)
    s2 = jnp.sum(jnp.sum(y3 * y3, axis=2, keepdims=True), axis=1, keepdims=True)
    mean = s1 * inv_n                              # (nb, 1, 1)
    var = s2 * inv_n - mean * mean
    rstd = lax.rsqrt(var + eps)                    # EUP

    # ---- scale/shift + LeakyReLU(0.01).  gamma/beta are zero outside the valid
    # region so garbage rows/channels come out as exact zeros.
    out = (y3 - mean) * (rstd * g_ref[...]) + bt_ref[...]
    out = jnp.where(out > 0, out, 0.01 * out)
    o_ref[...] = out.astype(o_ref.dtype)


def conv_ln_lrelu(x, wt, bias, gamma, beta, *, c_out, kh, kw, stride, padding,
                  out_dtype=jnp.float32):
    """Fused Conv2d -> LayerNorm([C,H,W]) -> LeakyReLU for one stage.

    x     : (N, H, W, Cin) NHWC activation (f32 or bf16)
    wt    : (K_pad, Cout_pad) bf16 im2col weights
    bias  : (1, Cout_pad) f32
    gamma, beta : (rows_pad, Cout_pad) f32, zeros outside the valid region
    returns (N, h_out, w_out, c_out) in out_dtype.
    """
    n, h, w, cin = x.shape
    k_pad, c_pad = wt.shape
    h_out = (h + 2 * padding - kh) // stride + 1
    w_out = (w + 2 * padding - kw) // stride + 1
    rows = h_out * w_out
    rows_pad = _round_up(rows, ROW_PAD)

    # ---- im2col in the wrapper.  With KH*KW*Cin <= 128 this costs the SAME
    # HBM bytes as a channel-padded NHWC layout, but lets the kernel do the
    # whole conv as one lane-dense 128-wide contraction.
    xp = jnp.pad(x, ((0, 0), (padding, padding), (padding, padding), (0, 0)))
    xp = xp.astype(jnp.bfloat16)
    taps = []
    for i in range(kh):
        for j in range(kw):
            taps.append(xp[:, i:i + (h_out - 1) * stride + 1:stride,
                           j:j + (w_out - 1) * stride + 1:stride, :])
    col = jnp.concatenate(taps, axis=-1).reshape(n, rows, kh * kw * cin)
    col = jnp.pad(col, ((0, 0), (0, rows_pad - rows),
                        (0, k_pad - kh * kw * cin)))

    # ---- batch packing per grid step (VMEM- and generation-aware).
    osize = jnp.dtype(out_dtype).itemsize
    bytes_per_sample = 2 * rows_pad * k_pad * 2 + 2 * rows_pad * c_pad * osize
    vmem_cap = _vmem_capacity_bytes()
    nb = _pick_samples_per_step(n, rows_pad, bytes_per_sample, vmem_cap // 2)
    grid = (-(-n // nb),)
    n_pad = grid[0] * nb
    if n_pad != n:
        # Padded samples produce harmless finite garbage (sliced off below).
        col = jnp.pad(col, ((0, n_pad - n), (0, 0), (0, 0)))

    kernel = functools.partial(_conv_ln_lrelu_kernel,
                               rows_valid=rows, c_out=c_out)

    # Raise the scoped-VMEM limit only when the estimate needs it; keep
    # headroom below device capacity for Mosaic-internal scratch / copies.
    params_bytes = 2 * (k_pad * c_pad * 2 + (1 + 2 * rows_pad) * c_pad * 4)
    est = nb * bytes_per_sample + params_bytes
    vmem_limit = None
    if est > 12 * 2 ** 20:
        vmem_limit = int(min(vmem_cap - 4 * 2 ** 20, 2 * est))

    out = pl.pallas_call(
        kernel,
        out_shape=jax.ShapeDtypeStruct((n_pad, rows_pad, c_pad), out_dtype),
        grid_spec=pltpu.PrefetchScalarGridSpec(
            num_scalar_prefetch=0,
            grid=grid,
            in_specs=[
                pl.BlockSpec((nb, rows_pad, k_pad), lambda i: (i, 0, 0)),
                # Grid-invariant operands (constant index_map -> DMA'd once).
                pl.BlockSpec((k_pad, c_pad), lambda i: (0, 0)),
                pl.BlockSpec((1, c_pad), lambda i: (0, 0)),
                pl.BlockSpec((rows_pad, c_pad), lambda i: (0, 0)),
                pl.BlockSpec((rows_pad, c_pad), lambda i: (0, 0)),
            ],
            out_specs=pl.BlockSpec((nb, rows_pad, c_pad), lambda i: (i, 0, 0)),
        ),
        compiler_params=pltpu.CompilerParams(
            dimension_semantics=("parallel",),
            vmem_limit_bytes=vmem_limit,
        ),
    )(col, wt, bias, gamma, beta)

    return out[:n, :rows, :c_out].reshape(n, h_out, w_out, c_out)


class ConvBlockPallas:
    """JAX/Pallas re-implementation of ConvBlock (reverse=False path)."""

    def __init__(self, in_channels, out_channels, in_dim, kernel_size=3,
                 stride=2, padding=1, block_size=1, reverse=False,
                 residual=False, *, key):
        if reverse:
            # TODO(synk): ConvTranspose2d (reverse=True) path not implemented.
            raise NotImplementedError("reverse=True not supported")
        self.block_size = block_size
        self.residual = residual
        self.stride = stride
        self.padding = padding
        self.in_channels = in_channels
        self.out_channels = out_channels

        def init_stage(k, c_in, c_out, ln_dim):
            k1, k2, k3, k4 = jax.random.split(k, 4)
            fan_in = c_in * kernel_size * kernel_size
            bound = 1.0 / math.sqrt(fan_in)
            w = jax.random.uniform(k1, (c_out, c_in, kernel_size, kernel_size),
                                   jnp.float32, -bound, bound)
            b = jax.random.uniform(k2, (c_out,), jnp.float32, -bound, bound)
            gamma = 1.0 + 0.1 * jax.random.normal(k3, (c_out, ln_dim, ln_dim),
                                                  jnp.float32)
            beta = 0.1 * jax.random.normal(k4, (c_out, ln_dim, ln_dim),
                                           jnp.float32)
            return w, b, gamma, beta

        def prep_stage(raw):
            w, b, gamma, beta = raw
            c_out_s, c_in, kh, kw = w.shape
            _, h_out, w_out = gamma.shape
            rows = h_out * w_out
            rows_pad = _round_up(rows, ROW_PAD)
            k_real = kh * kw * c_in
            k_pad = _round_up(k_real, LANE)
            cout_pad = _round_up(c_out_s, LANE)
            # (Cout, Cin, KH, KW) -> (KH*KW*Cin, Cout), zero-pad, bf16.
            # NOTE: zero padding of weights/bias/gamma/beta is what keeps the
            # padded rows/channels out of the LN statistics inside the kernel.
            wt = jnp.transpose(w, (2, 3, 1, 0)).reshape(k_real, c_out_s)
            wt = jnp.pad(wt, ((0, k_pad - k_real),
                              (0, cout_pad - c_out_s))).astype(jnp.bfloat16)
            bias = jnp.pad(b, (0, cout_pad - c_out_s)).reshape(1, cout_pad)

            def prep_affine(a):
                a = jnp.transpose(a, (1, 2, 0)).reshape(rows, c_out_s)
                return jnp.pad(a, ((0, rows_pad - rows),
                                   (0, cout_pad - c_out_s)))

            return dict(wt=wt, bias=bias, gamma=prep_affine(gamma),
                        beta=prep_affine(beta), c_out=c_out_s, kh=kh, kw=kw,
                        raw=raw)

        keys = jax.random.split(key, block_size)
        self.block_params = []
        if block_size > 1:
            for i in range(block_size - 1):
                raw = init_stage(keys[i], in_channels, in_channels,
                                 in_dim * stride)
                self.block_params.append(prep_stage(raw))
        raw = init_stage(keys[-1], in_channels, out_channels, in_dim)
        self.sample_params = prep_stage(raw)

    def _run_stage(self, x, p, stage_stride, out_dtype):
        return conv_ln_lrelu(x, p['wt'], p['bias'], p['gamma'], p['beta'],
                             c_out=p['c_out'], kh=p['kh'], kw=p['kw'],
                             stride=stage_stride, padding=self.padding,
                             out_dtype=out_dtype)

    def __call__(self, x_nchw):
        # NCHW -> NHWC once at block entry (real channels ride along the
        # im2col contraction dim, no 128-channel activation padding needed).
        x = jnp.transpose(x_nchw, (0, 2, 3, 1))
        if self.block_size > 1:
            h = x
            for p in self.block_params:
                # Intermediate stages emit bf16 -> halves inter-stage HBM traffic.
                h = self._run_stage(h, p, 1, jnp.bfloat16)
            x = x + h if self.residual else h
        out = self._run_stage(x, self.sample_params, self.stride, jnp.float32)
        return jnp.transpose(out, (0, 3, 1, 2))   # NHWC -> NCHW at block exit


# ---------------- pure-JAX reference (for correctness check) ----------------
def _ref_stage(x, w, b, gamma, beta, stride, padding):
    # bf16 conv inputs / f32 accumulation, matching the kernel's MXU numerics.
    y = lax.conv_general_dilated(
        x.astype(jnp.bfloat16), w.astype(jnp.bfloat16),
        (stride, stride), [(padding, padding)] * 2,
        dimension_numbers=("NCHW", "OIHW", "NCHW"),
        preferred_element_type=jnp.float32)
    y = y + b[None, :, None, None]
    mean = jnp.mean(y, axis=(1, 2, 3), keepdims=True)
    var = jnp.mean(jnp.square(y - mean), axis=(1, 2, 3), keepdims=True)
    y = (y - mean) * lax.rsqrt(var + 1e-5)
    y = y * gamma[None] + beta[None]
    return jnp.where(y > 0, y, 0.01 * y)


def _ref_forward(mod, x):
    if mod.block_size > 1:
        h = x
        for p in mod.block_params:
            w, b, g, bt = p['raw']
            # Match the kernel path's bf16 inter-stage activations.
            h = _ref_stage(h, w, b, g, bt, 1, mod.padding).astype(jnp.bfloat16)
        h = h.astype(jnp.float32)
        x = x + h if mod.residual else h
    w, b, g, bt = mod.sample_params['raw']
    return _ref_stage(x, w, b, g, bt, mod.stride, mod.padding)


if __name__ == "__main__":
    key = jax.random.PRNGKey(0)
    k_x, k_p = jax.random.split(key)

    # Input 16x16 spatial, stride-2 sample conv -> 8x8 output (in_dim=8).
    N, C_in, H, W = 2, 4, 16, 16
    C_out, in_dim = 8, 8
    x = jax.random.normal(k_x, (N, C_in, H, W), jnp.float32)

    mod = ConvBlockPallas(C_in, C_out, in_dim, kernel_size=3, stride=2,
                          padding=1, block_size=2, residual=True, key=k_p)

    out = jax.jit(mod.__call__)(x)
    out = jax.block_until_ready(out)

    ref = _ref_forward(mod, x)
    assert out.shape == (N, C_out, in_dim, in_dim), out.shape
    # bf16 MXU inputs and bf16 inter-stage activations on BOTH paths; the
    # remaining deviation is reduction-order rounding amplified by LayerNorm,
    # hence the 2e-2 tolerance. (The original torch module is pure f32 —
    # see correctness note in the header.)
    err = float(jnp.max(jnp.abs(out - ref)))
    assert jnp.allclose(out, ref, atol=2e-2, rtol=2e-2), err

    print("KERNEL_OK")
</pallas_src>

<mosaic_0001>
module attributes {stable_mosaic.version = 11 : i64} {
  func.func @_conv_ln_lrelu_kernel(%arg0: i32, %arg1: memref<1x256x128xbf16, #tpu.memory_space<vmem>>, %arg2: memref<128x128xbf16, #tpu.memory_space<vmem>>, %arg3: memref<1x128xf32, #tpu.memory_space<vmem>>, %arg4: memref<256x128xf32, #tpu.memory_space<vmem>>, %arg5: memref<256x128xf32, #tpu.memory_space<vmem>>, %arg6: memref<1x256x128xbf16, #tpu.memory_space<vmem>>) attributes {dimension_semantics = [#tpu.dimension_semantics<parallel>], iteration_bounds = array<i64: 2>, scalar_prefetch = 0 : i64, scratch_operands = 0 : i64, tpu.core_type = #tpu.core_type<tc>, window_params = [{transform_indices = @transform_0, window_bounds = array<i64: 1, 256, 128>}, {pipeline_mode = #tpu.pipeline_mode<synchronous>, transform_indices = @transform_1, window_bounds = array<i64: 128, 128>}, {pipeline_mode = #tpu.pipeline_mode<synchronous>, transform_indices = @transform_2, window_bounds = array<i64: 1, 128>}, {pipeline_mode = #tpu.pipeline_mode<synchronous>, transform_indices = @transform_3, window_bounds = array<i64: 256, 128>}, {pipeline_mode = #tpu.pipeline_mode<synchronous>, transform_indices = @transform_4, window_bounds = array<i64: 256, 128>}, {transform_indices = @transform_5, window_bounds = array<i64: 1, 256, 128>}]} {
    %c0 = arith.constant 0 : index
    %c0_0 = arith.constant 0 : index
    %c0_1 = arith.constant 0 : index
    %0 = vector.load %arg1[%c0, %c0_0, %c0_1] : memref<1x256x128xbf16, #tpu.memory_space<vmem>>, vector<1x256x128xbf16>
    %1 = vector.shape_cast %0 : vector<1x256x128xbf16> to vector<256x128xbf16>
    %c0_2 = arith.constant 0 : index
    %c0_3 = arith.constant 0 : index
    %2 = vector.load %arg2[%c0_2, %c0_3] : memref<128x128xbf16, #tpu.memory_space<vmem>>, vector<128x128xbf16>
    %cst = arith.constant dense<0.000000e+00> : vector<256x128xf32>
    %3 = tpu.matmul %1, %2, %cst {dimension_numbers = #tpu.dot_dimension_numbers<[1], [0], [0], [1], [0, 0, 1, 1], [], []>} : vector<256x128xbf16>, vector<128x128xbf16>, vector<256x128xf32> -> vector<256x128xf32>
    %c0_4 = arith.constant 0 : index
    %c0_5 = arith.constant 0 : index
    %4 = vector.load %arg3[%c0_4, %c0_5] : memref<1x128xf32, #tpu.memory_space<vmem>>, vector<1x128xf32>
    %5 = vector.broadcast %4 : vector<1x128xf32> to vector<256x128xf32>
    %6 = arith.addf %3, %5 : vector<256x128xf32>
    %7 = vector.shape_cast %6 : vector<256x128xf32> to vector<1x256x128xf32>
    %cst_6 = arith.constant dense<0.000000e+00> : vector<1x256xf32>
    %8 = vector.multi_reduction <add>, %7, %cst_6 [2] : vector<1x256x128xf32> to vector<1x256xf32>
    %9 = vector.shape_cast %8 : vector<1x256xf32> to vector<1x256x1xf32>
    %cst_7 = arith.constant dense<0.000000e+00> : vector<1x1xf32>
    %10 = vector.multi_reduction <add>, %9, %cst_7 [1] : vector<1x256x1xf32> to vector<1x1xf32>
    %11 = vector.shape_cast %10 : vector<1x1xf32> to vector<1x1x1xf32>
    %12 = arith.mulf %7, %7 : vector<1x256x128xf32>
    %cst_8 = arith.constant dense<0.000000e+00> : vector<1x256xf32>
    %13 = vector.multi_reduction <add>, %12, %cst_8 [2] : vector<1x256x128xf32> to vector<1x256xf32>
    %14 = vector.shape_cast %13 : vector<1x256xf32> to vector<1x256x1xf32>
    %cst_9 = arith.constant dense<0.000000e+00> : vector<1x1xf32>
    %15 = vector.multi_reduction <add>, %14, %cst_9 [1] : vector<1x256x1xf32> to vector<1x1xf32>
    %16 = vector.shape_cast %15 : vector<1x1xf32> to vector<1x1x1xf32>
    %cst_10 = arith.constant 9.765625E-4 : f32
    %17 = vector.broadcast %cst_10 : f32 to vector<1x1x1xf32>
    %18 = arith.mulf %11, %17 : vector<1x1x1xf32>
    %cst_11 = arith.constant 9.765625E-4 : f32
    %19 = vector.broadcast %cst_11 : f32 to vector<1x1x1xf32>
    %20 = arith.mulf %16, %19 : vector<1x1x1xf32>
    %21 = arith.mulf %18, %18 : vector<1x1x1xf32>
    %22 = arith.subf %20, %21 : vector<1x1x1xf32>
    %cst_12 = arith.constant 9.99999974E-6 : f32
    %23 = vector.broadcast %cst_12 : f32 to vector<1x1x1xf32>
    %24 = arith.addf %22, %23 : vector<1x1x1xf32>
    %25 = math.rsqrt %24 : vector<1x1x1xf32>
    %26 = vector.broadcast %18 : vector<1x1x1xf32> to vector<1x256x128xf32>
    %27 = arith.subf %7, %26 : vector<1x256x128xf32>
    %c0_13 = arith.constant 0 : index
    %c0_14 = arith.constant 0 : index
    %28 = vector.load %arg4[%c0_13, %c0_14] : memref<256x128xf32, #tpu.memory_space<vmem>>, vector<256x128xf32>
    %29 = vector.shape_cast %28 : vector<256x128xf32> to vector<1x256x128xf32>
    %30 = vector.broadcast %25 : vector<1x1x1xf32> to vector<1x256x128xf32>
    %31 = arith.mulf %30, %29 : vector<1x256x128xf32>
    %32 = arith.mulf %27, %31 : vector<1x256x128xf32>
    %c0_15 = arith.constant 0 : index
    %c0_16 = arith.constant 0 : index
    %33 = vector.load %arg5[%c0_15, %c0_16] : memref<256x128xf32, #tpu.memory_space<vmem>>, vector<256x128xf32>
    %34 = vector.shape_cast %33 : vector<256x128xf32> to vector<1x256x128xf32>
    %35 = arith.addf %32, %34 : vector<1x256x128xf32>
    %cst_17 = arith.constant 0.000000e+00 : f32
    %36 = vector.broadcast %cst_17 : f32 to vector<1x256x128xf32>
    %37 = arith.cmpf ogt, %35, %36 : vector<1x256x128xf32>
    %cst_18 = arith.constant 0.00999999977 : f32
    %38 = vector.broadcast %cst_18 : f32 to vector<1x256x128xf32>
    %39 = arith.mulf %38, %35 : vector<1x256x128xf32>
    %40 = arith.select %37, %35, %39 : vector<1x256x128xi1>, vector<1x256x128xf32>
    %41 = arith.truncf %40 : vector<1x256x128xf32> to vector<1x256x128xbf16>
    %c0_19 = arith.constant 0 : index
    %c0_20 = arith.constant 0 : index
    %c0_21 = arith.constant 0 : index
    %42 = vector.load %arg6[%c0_19, %c0_20, %c0_21] : memref<1x256x128xbf16, #tpu.memory_space<vmem>>, vector<1x256x128xbf16>
    tpu.vector_store %arg6[%c0_19, %c0_20, %c0_21], %41 {strides = array<i32>} : memref<1x256x128xbf16, #tpu.memory_space<vmem>>, vector<1x256x128xbf16>,
    return
  }
  func.func @transform_0(%arg0: i32) -> (i32, i32, i32) {
    %c0_i32 = arith.constant 0 : i32
    %c0_i32_0 = arith.constant 0 : i32
    %c0_i32_1 = arith.constant 0 : i32
    return %arg0, %c0_i32, %c0_i32_0 : i32, i32, i32
  }
  func.func @transform_1(%arg0: i32) -> (i32, i32) {
    %c0_i32 = arith.constant 0 : i32
    %c0_i32_0 = arith.constant 0 : i32
    %c0_i32_1 = arith.constant 0 : i32
    return %c0_i32, %c0_i32_0 : i32, i32
  }
  func.func @transform_2(%arg0: i32) -> (i32, i32) {
    %c0_i32 = arith.constant 0 : i32
    %c0_i32_0 = arith.constant 0 : i32
    %c0_i32_1 = arith.constant 0 : i32
    return %c0_i32, %c0_i32_0 : i32, i32
  }
  func.func @transform_3(%arg0: i32) -> (i32, i32) {
    %c0_i32 = arith.constant 0 : i32
    %c0_i32_0 = arith.constant 0 : i32
    %c0_i32_1 = arith.constant 0 : i32
    return %c0_i32, %c0_i32_0 : i32, i32
  }
  func.func @transform_4(%arg0: i32) -> (i32, i32) {
    %c0_i32 = arith.constant 0 : i32
    %c0_i32_0 = arith.constant 0 : i32
    %c0_i32_1 = arith.constant 0 : i32
    return %c0_i32, %c0_i32_0 : i32, i32
  }
  func.func @transform_5(%arg0: i32) -> (i32, i32, i32) {
    %c0_i32 = arith.constant 0 : i32
    %c0_i32_0 = arith.constant 0 : i32
    %c0_i32_1 = arith.constant 0 : i32
    return %arg0, %c0_i32, %c0_i32_0 : i32, i32, i32
  }
}

module attributes {stable_mosaic.version = 11 : i64} {
  func.func @_conv_ln_lrelu_kernel(%arg0: i32, %arg1: memref<2x64x128xbf16, #tpu.memory_space<vmem>>, %arg2: memref<128x128xbf16, #tpu.memory_space<vmem>>, %arg3: memref<1x128xf32, #tpu.memory_space<vmem>>, %arg4: memref<64x128xf32, #tpu.memory_space<vmem>>, %arg5: memref<64x128xf32, #tpu.memory_space<vmem>>, %arg6: memref<2x64x128xf32, #tpu.memory_space<vmem>>) attributes {dimension_semantics = [#tpu.dimension_semantics<parallel>], iteration_bounds = array<i64: 1>, scalar_prefetch = 0 : i64, scratch_operands = 0 : i64, tpu.core_type = #tpu.core_type<tc>, window_params = [{transform_indices = @transform_0, window_bounds = array<i64: 2, 64, 128>}, {pipeline_mode = #tpu.pipeline_mode<synchronous>, transform_indices = @transform_1, window_bounds = array<i64: 128, 128>}, {pipeline_mode = #tpu.pipeline_mode<synchronous>, transform_indices = @transform_2, window_bounds = array<i64: 1, 128>}, {pipeline_mode = #tpu.pipeline_mode<synchronous>, transform_indices = @transform_3, window_bounds = array<i64: 64, 128>}, {pipeline_mode = #tpu.pipeline_mode<synchronous>, transform_indices = @transform_4, window_bounds = array<i64: 64, 128>}, {transform_indices = @transform_5, window_bounds = array<i64: 2, 64, 128>}]} {
    %c0 = arith.constant 0 : index
    %c0_0 = arith.constant 0 : index
    %c0_1 = arith.constant 0 : index
    %0 = vector.load %arg1[%c0, %c0_0, %c0_1] : memref<2x64x128xbf16, #tpu.memory_space<vmem>>, vector<2x64x128xbf16>
    %1 = vector.shape_cast %0 : vector<2x64x128xbf16> to vector<128x128xbf16>
    %c0_2 = arith.constant 0 : index
    %c0_3 = arith.constant 0 : index
    %2 = vector.load %arg2[%c0_2, %c0_3] : memref<128x128xbf16, #tpu.memory_space<vmem>>, vector<128x128xbf16>
    %cst = arith.constant dense<0.000000e+00> : vector<128x128xf32>
    %3 = tpu.matmul %1, %2, %cst {dimension_numbers = #tpu.dot_dimension_numbers<[1], [0], [0], [1], [0, 0, 1, 1], [], []>} : vector<128x128xbf16>, vector<128x128xbf16>, vector<128x128xf32> -> vector<128x128xf32>
    %c0_4 = arith.constant 0 : index
    %c0_5 = arith.constant 0 : index
    %4 = vector.load %arg3[%c0_4, %c0_5] : memref<1x128xf32, #tpu.memory_space<vmem>>, vector<1x128xf32>
    %5 = vector.broadcast %4 : vector<1x128xf32> to vector<128x128xf32>
    %6 = arith.addf %3, %5 : vector<128x128xf32>
    %7 = vector.shape_cast %6 : vector<128x128xf32> to vector<2x64x128xf32>
    %cst_6 = arith.constant dense<0.000000e+00> : vector<2x64xf32>
    %8 = vector.multi_reduction <add>, %7, %cst_6 [2] : vector<2x64x128xf32> to vector<2x64xf32>
    %9 = vector.shape_cast %8 : vector<2x64xf32> to vector<2x64x1xf32>
    %cst_7 = arith.constant dense<0.000000e+00> : vector<2x1xf32>
    %10 = vector.multi_reduction <add>, %9, %cst_7 [1] : vector<2x64x1xf32> to vector<2x1xf32>
    %11 = vector.shape_cast %10 : vector<2x1xf32> to vector<2x1x1xf32>
    %12 = arith.mulf %7, %7 : vector<2x64x128xf32>
    %cst_8 = arith.constant dense<0.000000e+00> : vector<2x64xf32>
    %13 = vector.multi_reduction <add>, %12, %cst_8 [2] : vector<2x64x128xf32> to vector<2x64xf32>
    %14 = vector.shape_cast %13 : vector<2x64xf32> to vector<2x64x1xf32>
    %cst_9 = arith.constant dense<0.000000e+00> : vector<2x1xf32>
    %15 = vector.multi_reduction <add>, %14, %cst_9 [1] : vector<2x64x1xf32> to vector<2x1xf32>
    %16 = vector.shape_cast %15 : vector<2x1xf32> to vector<2x1x1xf32>
    %cst_10 = arith.constant 0.001953125 : f32
    %17 = vector.broadcast %cst_10 : f32 to vector<2x1x1xf32>
    %18 = arith.mulf %11, %17 : vector<2x1x1xf32>
    %cst_11 = arith.constant 0.001953125 : f32
    %19 = vector.broadcast %cst_11 : f32 to vector<2x1x1xf32>
    %20 = arith.mulf %16, %19 : vector<2x1x1xf32>
    %21 = arith.mulf %18, %18 : vector<2x1x1xf32>
    %22 = arith.subf %20, %21 : vector<2x1x1xf32>
    %cst_12 = arith.constant 9.99999974E-6 : f32
    %23 = vector.broadcast %cst_12 : f32 to vector<2x1x1xf32>
    %24 = arith.addf %22, %23 : vector<2x1x1xf32>
    %25 = math.rsqrt %24 : vector<2x1x1xf32>
    %26 = vector.broadcast %18 : vector<2x1x1xf32> to vector<2x64x128xf32>
    %27 = arith.subf %7, %26 : vector<2x64x128xf32>
    %c0_13 = arith.constant 0 : index
    %c0_14 = arith.constant 0 : index
    %28 = vector.load %arg4[%c0_13, %c0_14] : memref<64x128xf32, #tpu.memory_space<vmem>>, vector<64x128xf32>
    %29 = vector.shape_cast %28 : vector<64x128xf32> to vector<1x64x128xf32>
    %30 = vector.broadcast %25 : vector<2x1x1xf32> to vector<2x64x128xf32>
    %31 = vector.broadcast %29 : vector<1x64x128xf32> to vector<2x64x128xf32>
    %32 = arith.mulf %30, %31 : vector<2x64x128xf32>
    %33 = arith.mulf %27, %32 : vector<2x64x128xf32>
    %c0_15 = arith.constant 0 : index
    %c0_16 = arith.constant 0 : index
    %34 = vector.load %arg5[%c0_15, %c0_16] : memref<64x128xf32, #tpu.memory_space<vmem>>, vector<64x128xf32>
    %35 = vector.shape_cast %34 : vector<64x128xf32> to vector<1x64x128xf32>
    %36 = vector.broadcast %35 : vector<1x64x128xf32> to vector<2x64x128xf32>
    %37 = arith.addf %33, %36 : vector<2x64x128xf32>
    %cst_17 = arith.constant 0.000000e+00 : f32
    %38 = vector.broadcast %cst_17 : f32 to vector<2x64x128xf32>
    %39 = arith.cmpf ogt, %37, %38 : vector<2x64x128xf32>
    %cst_18 = arith.constant 0.00999999977 : f32
    %40 = vector.broadcast %cst_18 : f32 to vector<2x64x128xf32>
    %41 = arith.mulf %40, %37 : vector<2x64x128xf32>
    %42 = arith.select %39, %37, %41 : vector<2x64x128xi1>, vector<2x64x128xf32>
    %c0_19 = arith.constant 0 : index
    %c0_20 = arith.constant 0 : index
    %c0_21 = arith.constant 0 : index
    %43 = vector.load %arg6[%c0_19, %c0_20, %c0_21] : memref<2x64x128xf32, #tpu.memory_space<vmem>>, vector<2x64x128xf32>
    tpu.vector_store %arg6[%c0_19, %c0_20, %c0_21], %42 {strides = array<i32>} : memref<2x64x128xf32, #tpu.memory_space<vmem>>, vector<2x64x128xf32>,
    return
  }
  func.func @transform_0(%arg0: i32) -> (i32, i32, i32) {
    %c0_i32 = arith.constant 0 : i32
    %c0_i32_0 = arith.constant 0 : i32
    %c0_i32_1 = arith.constant 0 : i32
    return %arg0, %c0_i32, %c0_i32_0 : i32, i32, i32
  }
  func.func @transform_1(%arg0: i32) -> (i32, i32) {
    %c0_i32 = arith.constant 0 : i32
    %c0_i32_0 = arith.constant 0 : i32
    %c0_i32_1 = arith.constant 0 : i32
    return %c0_i32, %c0_i32_0 : i32, i32
  }
  func.func @transform_2(%arg0: i32) -> (i32, i32) {
    %c0_i32 = arith.constant 0 : i32
    %c0_i32_0 = arith.constant 0 : i32
    %c0_i32_1 = arith.constant 0 : i32
    return %c0_i32, %c0_i32_0 : i32, i32
  }
  func.func @transform_3(%arg0: i32) -> (i32, i32) {
    %c0_i32 = arith.constant 0 : i32
    %c0_i32_0 = arith.constant 0 : i32
    %c0_i32_1 = arith.constant 0 : i32
    return %c0_i32, %c0_i32_0 : i32, i32
  }
  func.func @transform_4(%arg0: i32) -> (i32, i32) {
    %c0_i32 = arith.constant 0 : i32
    %c0_i32_0 = arith.constant 0 : i32
    %c0_i32_1 = arith.constant 0 : i32
    return %c0_i32, %c0_i32_0 : i32, i32
  }
  func.func @transform_5(%arg0: i32) -> (i32, i32, i32) {
    %c0_i32 = arith.constant 0 : i32
    %c0_i32_0 = arith.constant 0 : i32
    %c0_i32_1 = arith.constant 0 : i32
    return %arg0, %c0_i32, %c0_i32_0 : i32, i32, i32
  }
}

</mosaic_0001>

<bundles_post_ra>
// kernel: a_call__.2
= control target key start
LH: loop header
LB: loop body
LE: loop exit
PB: predicated region body
PF: predicated region fallthrough
CT: control target
= control target key end

     0   :  { %s1467_s18 = smov 0   ;;  %s2384_s0 = inlined_call_operand.vmem [shape: bf16[2,256,128], index: 0, kind: input, shape index: {}]   ;;  %s2385_s1 = inlined_call_operand.vmem [shape: bf16[128,128], index: 1, kind: input, shape index: {}]   ;;  %s2386_s2 = inlined_call_operand.vmem [shape: f32[1,128], index: 2, kind: input, shape index: {}]   ;;  %s2387_s3 = inlined_call_operand.vmem [shape: f32[256,128], index: 3, kind: input, shape index: {}]   ;;  %s2388_s4 = inlined_call_operand.vmem [shape: f32[256,128], index: 4, kind: input, shape index: {}]   ;;  %s2389_s5 = inlined_call_operand.vmem [shape: bf16[2,256,128], index: 5, kind: output, shape index: {}]  }
   0x1 LB: > { %s1166_s19 = sadd.s32 4294967295, %s1435_s18   ;;  %p1170_p0 = scmp.ge.s32.totalorder %s1435_s18, 1  ;;  %s1435_s18 = sphi %s1467_s18, %s15_s18  }
   0x2   : > { %p187_p1 = scmp.lt.s32.totalorder %s1435_s18, 3 }
   0x4   : > { %p188_p2 = pnand %p1170_p0, %p187_p1 }
   0x6   : > { %191 = sbr.rel (%p188_p2) target bundleno = 567 (0x237), region = 40 }
   0xb   : > { %v1298_v0 = vld [vmem:[%s2385_s1 + $0x38] sm:$0xff]  ;;  %v1297_v1 = vld [vmem:[%s2385_s1 + $0x30] sm:$0xff]  ;;  %v1296_v2 = vld [vmem:[%s2385_s1 + $0x28] sm:$0xff]  ;;  %p215_p3 = scmp.lt.s32.totalorder %s1166_s19, 1 }
   0xc   : > { %421 = vmatpush.bf16.msra.mxu0 %v1298_v0  ;;  %1394 = vmatpush.bf16.msra.mxu1 %v1298_v0  ;;  %v1295_v3 = vld [vmem:[%s2385_s1 + $0x20] sm:$0xff]  ;;  %v1294_v4 = vld [vmem:[%s2385_s1 + $0x18] sm:$0xff]  ;;  %v1293_v5 = vld [vmem:[%s2385_s1 + $0x10] sm:$0xff] }
   0xd   : > { %1395 = vmatpush.bf16.msra.mxu2 %v1298_v0  ;;  %1396 = vmatpush.bf16.msra.mxu3 %v1298_v0  ;;  %s2541_s19 = smov (!%p215_p3, %s1166_s19), 1  ;;  %v1292_v6 = vld [vmem:[%s2385_s1 + $0x8] sm:$0xff]  ;;  %v1291_v7 = vld [vmem:[%s2385_s1] sm:$0xff] }
   0xe   : > { %s1273_s9 = sshll.u32 %s2541_s19, 7  ;;  %v1532_v24 = vld [vmem:[%s2386_s2] ss:$0 sm:$0xff] }
   0xf   : > { %s1511_s14 = scalar_lea.vmem %s2384_s0, %s1273_s9  ;;  %s2343_s15 = scalar_lea.vmem %s2389_s5, %s1273_s9 }
  0x10   : > { %422 = vmatpush.bf16.msra.mxu0 %v1297_v1  ;;  %1397 = vmatpush.bf16.msra.mxu1 %v1297_v1  ;;  %v1275_v8 = vld [vmem:[%s1511_s14] sm:$0xff]  ;;  %v1276_v12 = vld [vmem:[%s1511_s14 + $0x8] sm:$0xff]  ;;  %v1277_v16 = vld [vmem:[%s1511_s14 + $0x10] sm:$0xff] }
  0x11   : > { %1398 = vmatpush.bf16.msra.mxu2 %v1297_v1  ;;  %1399 = vmatpush.bf16.msra.mxu3 %v1297_v1  ;;  %v1279_v9 = vld [vmem:[%s1511_s14 + $0x20] sm:$0xff]  ;;  %v1280_v13 = vld [vmem:[%s1511_s14 + $0x28] sm:$0xff]  ;;  %v1281_v17 = vld [vmem:[%s1511_s14 + $0x30] sm:$0xff] }
  0x12   : > { %v1283_v10 = vld [vmem:[%s1511_s14 + $0x40] sm:$0xff]  ;;  %v1284_v14 = vld [vmem:[%s1511_s14 + $0x48] sm:$0xff]  ;;  %v1285_v18 = vld [vmem:[%s1511_s14 + $0x50] sm:$0xff] }
  0x13   : > { %v1287_v11 = vld [vmem:[%s1511_s14 + $0x60] sm:$0xff]  ;;  %v1288_v15 = vld [vmem:[%s1511_s14 + $0x68] sm:$0xff]  ;;  %v1289_v19 = vld [vmem:[%s1511_s14 + $0x70] sm:$0xff] }
  0x14   : > { %423 = vmatpush.bf16.msra.mxu0 %v1296_v2  ;;  %1400 = vmatpush.bf16.msra.mxu1 %v1296_v2  ;;  %v1282_v20 = vld [vmem:[%s1511_s14 + $0x38] sm:$0xff] }
  0x15   : > { %1401 = vmatpush.bf16.msra.mxu2 %v1296_v2  ;;  %1402 = vmatpush.bf16.msra.mxu3 %v1296_v2  ;;  %v1278_v21 = vld [vmem:[%s1511_s14 + $0x18] sm:$0xff] }
  0x16   : > { %v1286_v22 = vld [vmem:[%s1511_s14 + $0x58] sm:$0xff] }
  0x17   : > { %v1290_v23 = vld [vmem:[%s1511_s14 + $0x78] sm:$0xff] }
  0x18   : > { %424 = vmatpush.bf16.msra.mxu0 %v1295_v3  ;;  %1403 = vmatpush.bf16.msra.mxu1 %v1295_v3 }
  0x19   : > { %1404 = vmatpush.bf16.msra.mxu2 %v1295_v3  ;;  %1405 = vmatpush.bf16.msra.mxu3 %v1295_v3 }
  0x1c   : > { %425 = vmatpush.bf16.msra.mxu0 %v1294_v4  ;;  %1406 = vmatpush.bf16.msra.mxu1 %v1294_v4 }
  0x1d   : > { %1407 = vmatpush.bf16.msra.mxu2 %v1294_v4  ;;  %1408 = vmatpush.bf16.msra.mxu3 %v1294_v4 }
  0x20   : > { %426 = vmatpush.bf16.msra.mxu0 %v1293_v5  ;;  %1409 = vmatpush.bf16.msra.mxu1 %v1293_v5 }
  0x21   : > { %1410 = vmatpush.bf16.msra.mxu2 %v1293_v5  ;;  %1411 = vmatpush.bf16.msra.mxu3 %v1293_v5 }
  0x24   : > { %427 = vmatpush.bf16.msra.mxu0 %v1292_v6  ;;  %1412 = vmatpush.bf16.msra.mxu1 %v1292_v6 }
  0x25   : > { %1413 = vmatpush.bf16.msra.mxu2 %v1292_v6  ;;  %1414 = vmatpush.bf16.msra.mxu3 %v1292_v6 }
  0x28   : > { %428 = vmatpush.bf16.msra.mxu0 %v1291_v7  ;;  %1415 = vmatpush.bf16.msra.mxu1 %v1291_v7 }
  0x29   : > { %1416 = vmatpush.bf16.msra.mxu2 %v1291_v7  ;;  %1417 = vmatpush.bf16.msra.mxu3 %v1291_v7 }
  0x2b   : > { %429 = vmatmul.bf16.vlgmr.msra.gmra.mxu0 %v1275_v8  ;;  %449 = vmatmul.bf16.vlgmr.msra.gmra.mxu1 %v1279_v9 }
  0x2c   : > { %469 = vmatmul.bf16.vlgmr.msra.gmra.mxu2 %v1283_v10  ;;  %489 = vmatmul.bf16.vlgmr.msra.gmra.mxu3 %v1287_v11 }
  0x3b   : > { %434 = vmatmul.bf16.gmra.mxu0 %v1276_v12  ;;  %454 = vmatmul.bf16.gmra.mxu1 %v1280_v13 }
  0x3c   : > { %474 = vmatmul.bf16.gmra.mxu2 %v1284_v14  ;;  %494 = vmatmul.bf16.gmra.mxu3 %v1288_v15 }
  0x4b   : > { %439 = vmatmul.bf16.gmra.mxu0 %v1277_v16  ;;  %459 = vmatmul.bf16.gmra.mxu1 %v1281_v17 }
  0x4c   : > { %479 = vmatmul.bf16.gmra.mxu2 %v1285_v18  ;;  %499 = vmatmul.bf16.gmra.mxu3 %v1289_v19 }
  0x5b   : > { %464 = vmatmul.bf16.gmra.mxu1 %v1282_v20  ;;  %444 = vmatmul.bf16.gmra.mxu0 %v1278_v21 }
  0x5c   : > { %484 = vmatmul.bf16.gmra.mxu2 %v1286_v22  ;;  %504 = vmatmul.bf16.gmra.mxu3 %v1290_v23 }
  0xa8   : > { %v430_v25 = vpop.f32.mrf.mxu0  ;;  %v450_v26 = vpop.f32.mrf.mxu1 }
  0xa9   : > { %v1535_v27 = vadd.f32 %v1532_v24, %v430_v25  ;;  %v1538_v28 = vadd.f32 %v1532_v24, %v450_v26 }
  0xab   : > { %526 = vadd.xlane.f32.xlu2 %v1538_v28  ;;  %510 = vadd.xlane.f32.xlu0 %v1535_v27  ;;  %v619_v30 = vmul.f32 %v1538_v28, %v1538_v28  ;;  %v611_v33 = vmul.f32 %v1535_v27, %v1535_v27 }
  0xaf   : > { %v470_v29 = vpop.f32.mrf.mxu2  ;;  %v490_v11 = vpop.f32.mrf.mxu3 }
  0xb0   : > { %v1545_v31 = vadd.f32 %v1532_v24, %v470_v29  ;;  %v432_v32 = vpop.f32.mrf.mxu0  ;;  %v452_v34 = vpop.f32.mrf.mxu1 }
  0xb1   : > { %v1553_v38 = vadd.f32 %v1532_v24, %v432_v32  ;;  %v1564_v44 = vadd.f32 %v1532_v24, %v452_v34 }
  0xb2   : > { %2432 = vst [vmem:[#allocation2_spill] sm:$0xff] %v1545_v31  ;;  %542 = vadd.xlane.f32.xlu1 %v1545_v31  ;;  %v627_v37 = vmul.f32 %v1545_v31, %v1545_v31 }
  0xb3   : > { %659 = vadd.xlane.f32.xlu2 %v619_v30  ;;  %643 = vadd.xlane.f32.xlu0 %v611_v33  ;;  %v612_v43 = vmul.f32 %v1553_v38, %v1553_v38  ;;  %v620_v47 = vmul.f32 %v1564_v44, %v1564_v44 }
  0xb7   : > { %v472_v35 = vpop.f32.mrf.mxu2  ;;  %v492_v17 = vpop.f32.mrf.mxu3 }
  0xb8   : > { %v435_v36 = vpop.f32.mrf.mxu0  ;;  %v455_v41 = vpop.f32.mrf.mxu1  ;;  %v1582_v50 = vadd.f32 %v1532_v24, %v472_v35  ;;  %v1667_v35 = vadd.f32 %v1532_v24, %v490_v11 }
  0xb9   : > { %v1556_v39 = vadd.f32 %v1532_v24, %v435_v36  ;;  %v1579_v49 = vadd.f32 %v1532_v24, %v455_v41 }
  0xba   : > { %675 = vadd.xlane.f32.xlu1 %v627_v37  ;;  %2435 = vst [vmem:[#allocation5_spill] sm:$0xff] %v1582_v50  ;;  %v628_v54 = vmul.f32 %v1582_v50, %v1582_v50 }
  0xbb   : > { %512 = vadd.xlane.f32.xlu0 %v1553_v38  ;;  %v613_v40 = vmul.f32 %v1556_v39, %v1556_v39  ;;  %v621_v53 = vmul.f32 %v1579_v49, %v1579_v49  ;;  %2444 = vst [vmem:[#allocation14_spill] sm:$0xff] %v1667_v35 }
  0xbd   : > { %647 = vadd.xlane.f32.xlu2 %v613_v40 }
  0xbf   : > { %v475_v42 = vpop.f32.mrf.mxu2  ;;  %v495_v25 = vpop.f32.mrf.mxu3 }
  0xc0   : > { %v1567_v45 = vadd.f32 %v1532_v24, %v475_v42  ;;  %v457_v46 = vpop.f32.mrf.mxu1  ;;  %v437_v52 = vpop.f32.mrf.mxu0  ;;  %v1675_v41 = vadd.f32 %v1532_v24, %v495_v25  ;;  %v635_v42 = vmul.f32 %v1667_v35, %v1667_v35 }
  0xc1   : > { %v1575_v48 = vadd.f32 %v1532_v24, %v457_v46  ;;  %v1595_v56 = vadd.f32 %v1532_v24, %v437_v52 }
  0xc2   : > { %2433 = vst [vmem:[#allocation3_spill] sm:$0xff] %v1567_v45  ;;  %645 = vadd.xlane.f32.xlu1 %v612_v43  ;;  %v629_v51 = vmul.f32 %v1567_v45, %v1567_v45 }
  0xc3   : > { %528 = vadd.xlane.f32.xlu0 %v1564_v44  ;;  %2434 = vst [vmem:[#allocation4_spill] sm:$0xff] %v1575_v48  ;;  %v622_v55 = vmul.f32 %v1575_v48, %v1575_v48  ;;  %v614_v59 = vmul.f32 %v1595_v56, %v1595_v56 }
  0xc4   : > { %2445 = vst [vmem:[#allocation15_spill] sm:$0xff] %v1675_v41 }
  0xc5   : > { %546 = vadd.xlane.f32.xlu2 %v1567_v45 }
  0xc7   : > { %v477_v60 = vpop.f32.mrf.mxu2  ;;  %v497_v34 = vpop.f32.mrf.mxu3 }
  0xc8   : > { %v440_v57 = vpop.f32.mrf.mxu0  ;;  %v460_v61 = vpop.f32.mrf.mxu1  ;;  %v1608_v63 = vadd.f32 %v1532_v24, %v477_v60 }
  0xc9   : > { %v1598_v58 = vadd.f32 %v1532_v24, %v440_v57  ;;  %v1605_v62 = vadd.f32 %v1532_v24, %v460_v61  ;;  %v1693_v61 = vadd.f32 %v1532_v24, %v492_v17 }
  0xca   : > { %514 = vadd.xlane.f32.xlu1 %v1556_v39  ;;  %2437 = vst [vmem:[#allocation7_spill] sm:$0xff] %v1608_v63  ;;  %v630_v3 = vmul.f32 %v1608_v63, %v1608_v63 }
  0xcb   : > { %661 = vadd.xlane.f32.xlu0 %v620_v47  ;;  %2436 = vst [vmem:[#allocation6_spill] sm:$0xff] %v1605_v62  ;;  %v623_v4 = vmul.f32 %v1605_v62, %v1605_v62  ;;  %v615_v8 = vmul.f32 %v1598_v58, %v1598_v58  ;;  %v636_v11 = vmul.f32 %v1693_v61, %v1693_v61 }
  0xcc   : > { %2446 = vst [vmem:[#allocation16_spill] sm:$0xff] %v1693_v61 }
  0xcd   : > { %532 = vadd.xlane.f32.xlu2 %v1575_v48 }
  0xcf   : > { %v480_v2 = vpop.f32.mrf.mxu2  ;;  %v500_v43 = vpop.f32.mrf.mxu3 }
  0xd0   : > { %v442_v0 = vpop.f32.mrf.mxu0  ;;  %v462_v6 = vpop.f32.mrf.mxu1  ;;  %v1625_v9 = vadd.f32 %v1532_v24, %v480_v2 }
  0xd1   : > { %v1612_v1 = vadd.f32 %v1532_v24, %v442_v0  ;;  %v1633_v12 = vadd.f32 %v1532_v24, %v462_v6 }
  0xd2   : > { %530 = vadd.xlane.f32.xlu1 %v1579_v49  ;;  %2438 = vst [vmem:[#allocation8_spill] sm:$0xff] %v1625_v9  ;;  %v631_v15 = vmul.f32 %v1625_v9, %v1625_v9 }
  0xd3   : > { %544 = vadd.xlane.f32.xlu0 %v1582_v50  ;;  %v616_v5 = vmul.f32 %v1612_v1, %v1612_v1  ;;  %2440 = vst [vmem:[#allocation10_spill] sm:$0xff] %v1633_v12  ;;  %v624_v19 = vmul.f32 %v1633_v12, %v1633_v12 }
  0xd5   : > { %679 = vadd.xlane.f32.xlu2 %v629_v51 }
  0xd7   : > { %v482_v7 = vpop.f32.mrf.mxu2  ;;  %v502_v57 = vpop.f32.mrf.mxu3 }
  0xd8   : > { %v1628_v10 = vadd.f32 %v1532_v24, %v482_v7  ;;  %v465_v13 = vpop.f32.mrf.mxu1  ;;  %v445_v16 = vpop.f32.mrf.mxu0  ;;  %v1696_v2 = vadd.f32 %v1532_v24, %v502_v57 }
  0xd9   : > { %v1636_v14 = vadd.f32 %v1532_v24, %v465_v13  ;;  %v1643_v18 = vadd.f32 %v1532_v24, %v445_v16 }
  0xda   : > { %663 = vadd.xlane.f32.xlu1 %v621_v53  ;;  %2439 = vst [vmem:[#allocation9_spill] sm:$0xff] %v1628_v10  ;;  %v632_v20 = vmul.f32 %v1628_v10, %v1628_v10  ;;  %v637_v53 = vmul.f32 %v1675_v41, %v1675_v41 }
  0xdb   : > { %677 = vadd.xlane.f32.xlu0 %v628_v54  ;;  %2441 = vst [vmem:[#allocation11_spill] sm:$0xff] %v1636_v14  ;;  %v617_v26 = vmul.f32 %v1643_v18, %v1643_v18  ;;  %v625_v33 = vmul.f32 %v1636_v14, %v1636_v14 }
  0xdc   : > { %2447 = vst [vmem:[#allocation17_spill] sm:$0xff] %v1696_v2 }
  0xdd   : > { %665 = vadd.xlane.f32.xlu2 %v622_v55 }
  0xdf   : > { %v485_v21 = vpop.f32.mrf.mxu2 }
  0xe0   : > { %v1651_v22 = vadd.f32 %v1532_v24, %v485_v21  ;;  %v467_v23 = vpop.f32.mrf.mxu1  ;;  %v447_v30 = vpop.f32.mrf.mxu0  ;;  %v1719_v21 = vadd.f32 %v1532_v24, %v500_v43 }
  0xe1   : > { %v1657_v29 = vadd.f32 %v1532_v24, %v467_v23  ;;  %v1661_v32 = vadd.f32 %v1532_v24, %v447_v30  ;;  %v505_v23 = vpop.f32.mrf.mxu3 }
  0xe2   : > { %516 = vadd.xlane.f32.xlu1 %v1595_v56  ;;  %2442 = vst [vmem:[#allocation12_spill] sm:$0xff] %v1651_v22  ;;  %v633_v52 = vmul.f32 %v1651_v22, %v1651_v22 }
  0xe3   : > { %649 = vadd.xlane.f32.xlu0 %v614_v59  ;;  %2443 = vst [vmem:[#allocation13_spill] sm:$0xff] %v1657_v29  ;;  %v618_v40 = vmul.f32 %v1661_v32, %v1661_v32  ;;  %v626_v54 = vmul.f32 %v1657_v29, %v1657_v29 }
  0xe4   : > { %2450 = vst [vmem:[#allocation20_spill] sm:$0xff] %v1719_v21 }
  0xe5   : > { %518 = vadd.xlane.f32.xlu2 %v1598_v58 }
  0xe9   : > { %v507_v43 = vpop.f32.mrf.mxu3 }
  0xea   : > { %548 = vadd.xlane.f32.xlu1 %v1608_v63 }
  0xeb   : > { %534 = vadd.xlane.f32.xlu0 %v1605_v62 }
  0xed   : > { %520 = vadd.xlane.f32.xlu2 %v1612_v1 }
  0xf2   : > { %681 = vadd.xlane.f32.xlu1 %v630_v3  ;;  %v1700_v3 = vadd.f32 %v1532_v24, %v497_v34 }
  0xf3   : > { %667 = vadd.xlane.f32.xlu0 %v623_v4 }
  0xf4   : > { %2448 = vst [vmem:[#allocation18_spill] sm:$0xff] %v1700_v3  ;;  %v638_v16 = vmul.f32 %v1700_v3, %v1700_v3 }
  0xf5   : > { %653 = vadd.xlane.f32.xlu2 %v616_v5  ;;  %v487_v5 = vpop.f32.mrf.mxu2 }
  0xfa   : > { %651 = vadd.xlane.f32.xlu1 %v615_v8 }
  0xfb   : > { %550 = vadd.xlane.f32.xlu0 %v1625_v9 }
  0xfd   : > { %552 = vadd.xlane.f32.xlu2 %v1628_v10 }
 0x102   : > { %536 = vadd.xlane.f32.xlu1 %v1633_v12 }
 0x103   : > { %683 = vadd.xlane.f32.xlu0 %v631_v15  ;;  %v1711_v15 = vadd.f32 %v1532_v24, %v487_v5 }
 0x105   : > { %538 = vadd.xlane.f32.xlu2 %v1636_v14  ;;  %2449 = vst [vmem:[#allocation19_spill] sm:$0xff] %v1711_v15  ;;  %v634_v30 = vmul.f32 %v1711_v15, %v1711_v15 }
 0x10a   : > { %669 = vadd.xlane.f32.xlu1 %v624_v19 }
 0x10b   : > { %522 = vadd.xlane.f32.xlu0 %v1643_v18 }
 0x10d   : > { %685 = vadd.xlane.f32.xlu2 %v632_v20 }
 0x112   : > { %554 = vadd.xlane.f32.xlu1 %v1651_v22 }
 0x113   : > { %655 = vadd.xlane.f32.xlu0 %v617_v26  ;;  %v1722_v26 = vadd.f32 %v1532_v24, %v505_v23 }
 0x115   : > { %540 = vadd.xlane.f32.xlu2 %v1657_v29  ;;  %2451 = vst [vmem:[#allocation21_spill] sm:$0xff] %v1722_v26 }
 0x11a   : > { %524 = vadd.xlane.f32.xlu1 %v1661_v32 }
 0x11b   : > { %671 = vadd.xlane.f32.xlu0 %v625_v33 }
 0x11d   : > { %558 = vadd.xlane.f32.xlu2 %v1667_v35 }
 0x11e   : > { %v1670_v36 = vpop.xlane.xlu2 %526  ;;  %v511_v37 = vpop.xlane.xlu0 %510 }
 0x122   : > { %657 = vadd.xlane.f32.xlu1 %v618_v40  ;;  %v639_v40 = vmul.f32 %v1719_v21, %v1719_v21 }
 0x123   : > { %562 = vadd.xlane.f32.xlu0 %v1675_v41 }
 0x125   : > { %v1680_v46 = vpop.xlane.xlu1 %542  ;;  %691 = vadd.xlane.f32.xlu2 %v635_v42  ;;  %v640_v42 = vmul.f32 %v1696_v2, %v1696_v2 }
 0x126   : > { %v644_v47 = vpop.xlane.xlu0 %643  ;;  %v1682_v51 = vpop.xlane.xlu2 %659 }
 0x12a   : > { %687 = vadd.xlane.f32.xlu1 %v633_v52  ;;  %v1739_v52 = vadd.f32 %v1532_v24, %v507_v43 }
 0x12b   : > { %695 = vadd.xlane.f32.xlu0 %v637_v53 }
 0x12c   : > { %2452 = vst [vmem:[#allocation22_spill] sm:$0xff] %v1739_v52 }
 0x12d   : > { %v1690_v55 = vpop.xlane.xlu1 %675  ;;  %673 = vadd.xlane.f32.xlu2 %v626_v54 }
 0x12e   : > { %v513_v59 = vpop.xlane.xlu0 %512 }
 0x12f   : > { %v574_v60 = vadd.f32 %v513_v59, %v511_v37  ;;  %v642_v59 = vmul.f32 %v1739_v52, %v1739_v52 }
 0x130   : > { %v648_v0 = vpop.xlane.xlu2 %647 }
 0x132   : > { %560 = vadd.xlane.f32.xlu1 %v1693_v61 }
 0x133   : > { %568 = vadd.xlane.f32.xlu0 %v1696_v2 }
 0x135   : > { %v646_v4 = vpop.xlane.xlu1 %645  ;;  %564 = vadd.xlane.f32.xlu2 %v1700_v3 }
 0x136   : > { %v707_v6 = vadd.f32 %v646_v4, %v644_v47  ;;  %v1704_v7 = vpop.xlane.xlu0 %528  ;;  %v641_v47 = vmul.f32 %v1722_v26, %v1722_v26 }
 0x138   : > { %v1706_v8 = vpop.xlane.xlu2 %546  ;;  %v708_v13 = vadd.f32 %v707_v6, %v648_v0 }
 0x13a   : > { %693 = vadd.xlane.f32.xlu1 %v636_v11 }
 0x13b   : > { %556 = vadd.xlane.f32.xlu0 %v1711_v15 }
 0x13d   : > { %v515_v17 = vpop.xlane.xlu1 %514  ;;  %697 = vadd.xlane.f32.xlu2 %v638_v16 }
 0x13e   : > { %v575_v19 = vadd.f32 %v574_v60, %v515_v17  ;;  %v1716_v20 = vpop.xlane.xlu0 %661 }
 0x140   : > { %v533_v25 = vpop.xlane.xlu2 %532 }
 0x142   : > { %566 = vadd.xlane.f32.xlu1 %v1719_v21 }
 0x143   : > { %689 = vadd.xlane.f32.xlu0 %v634_v30 }
 0x145   : > { %v531_v33 = vpop.xlane.xlu1 %530  ;;  %570 = vadd.xlane.f32.xlu2 %v1722_v26 }
 0x146   : > { %v1728_v34 = vpop.xlane.xlu0 %544 }
 0x148   : > { %v1730_v37 = vpop.xlane.xlu2 %679 }
 0x14a   : > { %699 = vadd.xlane.f32.xlu1 %v639_v40 }
 0x14b   : > { %701 = vadd.xlane.f32.xlu0 %v640_v42 }
 0x14d   : > { %v664_v53 = vpop.xlane.xlu1 %663  ;;  %703 = vadd.xlane.f32.xlu2 %v641_v47 }
 0x14e   : > { %v1741_v54 = vpop.xlane.xlu0 %677 }
 0x150   : > { %v666_v57 = vpop.xlane.xlu2 %665 }
 0x152   : > { %572 = vadd.xlane.f32.xlu1 %v1739_v52 }
 0x153   : > { %705 = vadd.xlane.f32.xlu0 %v642_v59 }
 0x155   : > { %v517_v60 = vpop.xlane.xlu1 %516 }
 0x156   : > { %v650_v0 = vpop.xlane.xlu0 %649  ;;  %v576_v21 = vadd.f32 %v575_v19, %v517_v60 }
 0x157   : > { %v709_v15 = vadd.f32 %v708_v13, %v650_v0 }
 0x158   : > { %v519_v4 = vpop.xlane.xlu2 %518 }
 0x159   : > { %v577_v41 = vadd.f32 %v576_v21, %v519_v4 }
 0x15d   : > { %v549_v5 = vpop.xlane.xlu1 %548 }
 0x15e   : > { %v535_v6 = vpop.xlane.xlu0 %534 }
 0x160   : > { %v521_v11 = vpop.xlane.xlu2 %520 }
 0x161   : > { %v578_v35 = vadd.f32 %v577_v41, %v521_v11 }
 0x165   : > { %v1746_v16 = vpop.xlane.xlu1 %681 }
 0x166   : > { %v668_v24 = vpop.xlane.xlu0 %667 }
 0x168   : > { %v654_v17 = vpop.xlane.xlu2 %653 }
 0x16d   : > { %v652_v23 = vpop.xlane.xlu1 %651 }
 0x16e   : > { %v551_v30 = vpop.xlane.xlu0 %550  ;;  %v710_v9 = vadd.f32 %v709_v15, %v652_v23 }
 0x170   : > { %v553_v40 = vpop.xlane.xlu2 %552  ;;  %v711_v29 = vadd.f32 %v710_v9, %v654_v17 }
 0x175   : > { %v537_v42 = vpop.xlane.xlu1 %536 }
 0x176   : > { %v684_v43 = vpop.xlane.xlu0 %683 }
 0x178   : > { %v539_v47 = vpop.xlane.xlu2 %538 }
 0x17d   : > { %v670_v26 = vpop.xlane.xlu1 %669 }
 0x17e   : > { %v523_v2 = vpop.xlane.xlu0 %522 }
 0x17f   : > { %v579_v22 = vadd.f32 %v578_v35, %v523_v2 }
 0x180   : > { %v686_v52 = vpop.xlane.xlu2 %685 }
 0x185   : > { %v555_v59 = vpop.xlane.xlu1 %554 }
 0x186   : > { %v656_v3 = vpop.xlane.xlu0 %655 }
 0x187   : > { %v712_v12 = vadd.f32 %v711_v29, %v656_v3 }
 0x188   : > { %v541_v61 = vpop.xlane.xlu2 %540 }
 0x18d   : > { %v525_v10 = vpop.xlane.xlu1 %524 }
 0x18e   : > { %v580_v63 = vadd.f32 %v579_v22, %v525_v10  ;;  %v672_v45 = vpop.xlane.xlu0 %671 }
 0x190   : > { %v581_v50 = vadd.f32 %v580_v63, %v1670_v36  ;;  %v559_v31 = vpop.xlane.xlu2 %558 }
 0x192   : > { %v582_v14 = vadd.f32 %v581_v50, %v1704_v7 }
 0x194   : > { %v583_v62 = vadd.f32 %v582_v14, %v531_v33 }
 0x195   : > { %v658_v48 = vpop.xlane.xlu1 %657 }
 0x196   : > { %v584_v19 = vadd.f32 %v583_v62, %v533_v25  ;;  %v713_v60 = vadd.f32 %v712_v12, %v658_v48  ;;  %v563_v21 = vpop.xlane.xlu0 %562 }
 0x198   : > { %v585_v4 = vadd.f32 %v584_v19, %v535_v6  ;;  %v714_v41 = vadd.f32 %v713_v60, %v1682_v51  ;;  %v692_v35 = vpop.xlane.xlu2 %691 }
 0x19a   : > { %v586_v2 = vadd.f32 %v585_v4, %v537_v42  ;;  %v715_v10 = vadd.f32 %v714_v41, %v1716_v20 }
 0x19c   : > { %v587_v22 = vadd.f32 %v586_v2, %v539_v47  ;;  %v716_v13 = vadd.f32 %v715_v10, %v664_v53 }
 0x19d   : > { %v688_v63 = vpop.xlane.xlu1 %687 }
 0x19e   : > { %v696_v36 = vpop.xlane.xlu0 %695  ;;  %v717_v9 = vadd.f32 %v716_v13, %v666_v57  ;;  %v588_v15 = vadd.f32 %v587_v22, %v541_v61 }
 0x1a0   : > { %v674_v50 = vpop.xlane.xlu2 %673  ;;  %v718_v29 = vadd.f32 %v717_v9, %v668_v24  ;;  %v589_v14 = vadd.f32 %v588_v15, %v1680_v46 }
 0x1a2   : > { %v719_v62 = vadd.f32 %v718_v29, %v670_v26  ;;  %v590_v48 = vadd.f32 %v589_v14, %v1728_v34 }
 0x1a4   : > { %v720_v12 = vadd.f32 %v719_v62, %v672_v45  ;;  %v591_v51 = vadd.f32 %v590_v48, %v1706_v8 }
 0x1a5   : > { %v561_v3 = vpop.xlane.xlu1 %560 }
 0x1a6   : > { %v721_v7 = vadd.f32 %v720_v12, %v674_v50  ;;  %v569_v25 = vpop.xlane.xlu0 %568  ;;  %v592_v20 = vadd.f32 %v591_v51, %v549_v5 }
 0x1a8   : > { %v722_v33 = vadd.f32 %v721_v7, %v1690_v55  ;;  %v565_v53 = vpop.xlane.xlu2 %564  ;;  %v593_v0 = vadd.f32 %v592_v20, %v551_v30 }
 0x1aa   : > { %v723_v61 = vadd.f32 %v722_v33, %v1741_v54  ;;  %v594_v57 = vadd.f32 %v593_v0, %v553_v40 }
 0x1ac   : > { %v724_v6 = vadd.f32 %v723_v61, %v1730_v37  ;;  %v595_v26 = vadd.f32 %v594_v57, %v555_v59 }
 0x1ad   : > { %v694_v46 = vpop.xlane.xlu1 %693 }
 0x1ae   : > { %v557_v11 = vpop.xlane.xlu0 %556  ;;  %v725_v45 = vadd.f32 %v724_v6, %v1746_v16 }
 0x1af   : > { %v596_v34 = vadd.f32 %v595_v26, %v557_v11 }
 0x1b0   : > { %v698_v8 = vpop.xlane.xlu2 %697  ;;  %v726_v24 = vadd.f32 %v725_v45, %v684_v43  ;;  %v813_v45 = vld [vmem:[%s2387_s3 + $0xb0] sm:$0xff] }
 0x1b1   : > { %v597_v17 = vadd.f32 %v596_v34, %v559_v31 }
 0x1b2   : > { %v727_v23 = vadd.f32 %v726_v24, %v686_v52 }
 0x1b3   : > { %v598_v5 = vadd.f32 %v597_v17, %v561_v3 }
 0x1b4   : > { %v728_v47 = vadd.f32 %v727_v23, %v688_v63 }
 0x1b5   : > { %v567_v42 = vpop.xlane.xlu1 %566  ;;  %v599_v55 = vadd.f32 %v598_v5, %v563_v21 }
 0x1b6   : > { %v690_v30 = vpop.xlane.xlu0 %689 }
 0x1b7   : > { %v729_v19 = vadd.f32 %v728_v47, %v690_v30  ;;  %v600_v54 = vadd.f32 %v599_v55, %v565_v53  ;;  %v2453_v47 = vld [vmem:[#allocation4_spill] sm:$0xff]  ;;  %v806_v55 = vld [vmem:[%s2387_s3 + $0x78] sm:$0xff] }
 0x1b8   : > { %v571_v60 = vpop.xlane.xlu2 %570  ;;  %v809_v30 = vld [vmem:[%s2387_s3 + $0x90] sm:$0xff] }
 0x1b9   : > { %v730_v40 = vadd.f32 %v729_v19, %v692_v35  ;;  %v601_v4 = vadd.f32 %v600_v54, %v567_v42  ;;  %v807_v42 = vld [vmem:[%s2387_s3 + $0x80] sm:$0xff]  ;;  %v808_v54 = vld [vmem:[%s2387_s3 + $0x88] sm:$0xff] }
 0x1bb   : > { %v731_v37 = vadd.f32 %v730_v40, %v694_v46  ;;  %v602_v10 = vadd.f32 %v601_v4, %v569_v25 }
 0x1bd   : > { %v700_v59 = vpop.xlane.xlu1 %699  ;;  %v732_v41 = vadd.f32 %v731_v37, %v696_v36  ;;  %v603_v31 = vadd.f32 %v602_v10, %v571_v60  ;;  %v803_v37 = vld [vmem:[%s2387_s3 + $0x60] sm:$0xff] }
 0x1be   : > { %v702_v2 = vpop.xlane.xlu0 %701 }
 0x1bf   : > { %v733_v16 = vadd.f32 %v732_v41, %v698_v8 }
 0x1c0   : > { %v704_v52 = vpop.xlane.xlu2 %703 }
 0x1c1   : > { %v734_v22 = vadd.f32 %v733_v16, %v700_v59  ;;  %v805_v59 = vld [vmem:[%s2387_s3 + $0x70] sm:$0xff] }
 0x1c3   : > { %v735_v43 = vadd.f32 %v734_v22, %v702_v2 }
 0x1c5   : > { %v736_v13 = vadd.f32 %v735_v43, %v704_v52  ;;  %v573_v9 = vpop.xlane.xlu1 %572 }
 0x1c6   : > { %v604_v21 = vadd.f32 %v603_v31, %v573_v9  ;;  %v706_v63 = vpop.xlane.xlu0 %705  ;;  %v792_v9 = vld [vmem:[%s2387_s3 + $0x8] sm:$0xff] }
 0x1c7   : > { %v737_v15 = vadd.f32 %v736_v13, %v706_v63  ;;  %v791_v13 = vld [vmem:[%s2387_s3] sm:$0xff]  ;;  %v794_v63 = vld [vmem:[%s2387_s3 + $0x18] sm:$0xff] }
 0x1c8   : > { %v605_v50 = vrot.slane %v604_v21, 4 }
 0x1c9   : > { %v738_v29 = vrot.slane %v737_v15, 4 }
 0x1ca   : > { %v606_v35 = vadd.f32 %v605_v50, %v604_v21  ;;  %v793_v21 = vld [vmem:[%s2387_s3 + $0x10] sm:$0xff] }
 0x1cb   : > { %v739_v14 = vadd.f32 %v738_v29, %v737_v15 }
 0x1cc   : > { %v607_v62 = vrot.slane %v606_v35, 2 }
 0x1cd   : > { %v740_v48 = vrot.slane %v739_v14, 2 }
 0x1ce   : > { %v608_v12 = vadd.f32 %v607_v62, %v606_v35 }
 0x1cf   : > { %v741_v36 = vadd.f32 %v740_v48, %v739_v14  ;;  %v802_v48 = vld [vmem:[%s2387_s3 + $0x58] sm:$0xff] }
 0x1d0   : > { %v609_v51 = vrot.slane %v608_v12, 1  ;;  %v810_v14 = vld [vmem:[%s2387_s3 + $0x98] sm:$0xff] }
 0x1d1   : > { %v742_v7 = vrot.slane %v741_v36, 1 }
 0x1d2   : > { %v610_v3 = vadd.f32 %v609_v51, %v608_v12  ;;  %v795_v51 = vld [vmem:[%s2387_s3 + $0x20] sm:$0xff] }
 0x1d3   : > { %v743_v20 = vadd.f32 %v742_v7, %v741_v36  ;;  %v797_v7 = vld [vmem:[%s2387_s3 + $0x30] sm:$0xff] }
 0x1d4   : > { %v1759_v25 = vmul.f32 0.0009765625, %v610_v3  ;;  %v796_v3 = vld [vmem:[%s2387_s3 + $0x28] sm:$0xff]  ;;  %v801_v36 = vld [vmem:[%s2387_s3 + $0x50] sm:$0xff] }
 0x1d5   : > { %v745_v53 = vmul.f32 0.0009765625, %v743_v20  ;;  %v798_v20 = vld [vmem:[%s2387_s3 + $0x38] sm:$0xff] }
 0x1d6   : > { %v746_v33 = vmul.f32 %v1759_v25, %v1759_v25  ;;  %v2474_v60 = vsub.f32 %v1535_v27, %v1759_v25  ;;  %v2479_v27 = vsub.f32 %v1612_v1, %v1759_v25  ;;  %v2484_v1 = vsub.f32 %v1579_v49, %v1759_v25 }
 0x1d8   : > { %v747_v0 = vsub.f32 %v745_v53, %v746_v33 }
 0x1da   : > { %v748_v61 = vadd.f32 1e-05, %v747_v0 }
 0x1dc   : > { %1427 = vrsqrt.f32 %v748_v61  ;;  %vm755_vm1 = vweird.f32 %v748_v61 }
 0x1e2   : > { %v1428_v57 = vpop.eup %1427 }
 0x1e3   : > { %v750_v6 = vmul.f32 %v1428_v57, %v748_v61  ;;  %vm756_vm0 = vweird.f32 %v1428_v57  ;;  %v804_v61 = vld [vmem:[%s2387_s3 + $0x68] sm:$0xff] }
 0x1e4   : > { %vm757_vm2 = vmor %vm755_vm1, %vm756_vm0 }
 0x1e5   : > { %v751_v24 = vmul.f32 %v1428_v57, %v750_v6 }
 0x1e7   : > { %v752_v40 = vmul.f32 0.5, %v751_v24  ;;  %v799_v24 = vld [vmem:[%s2387_s3 + $0x40] sm:$0xff] }
 0x1e9   : > { %v753_v15 = vsub.f32 1.5, %v752_v40  ;;  %v800_v40 = vld [vmem:[%s2387_s3 + $0x48] sm:$0xff] }
 0x1eb   : > { %v754_v53 = vmul.f32 %v1428_v57, %v753_v15 }
 0x1ed   : > { %v758_v5 = vsel %vm757_vm2, %v1428_v57, %v754_v53  ;;  %v811_v57 = vld [vmem:[%s2387_s3 + $0xa0] sm:$0xff]  ;;  %v812_v53 = vld [vmem:[%s2387_s3 + $0xa8] sm:$0xff] }
 0x1ee   : > { %v823_v23 = vmul.f32 %v791_v13, %v758_v5  ;;  %v824_v17 = vmul.f32 %v792_v9, %v758_v5  ;;  %v825_v8 = vmul.f32 %v793_v21, %v758_v5  ;;  %v826_v34 = vmul.f32 %v794_v63, %v758_v5  ;;  %v814_v13 = vld [vmem:[%s2387_s3 + $0xb8] sm:$0xff]  ;;  %v815_v9 = vld [vmem:[%s2387_s3 + $0xc0] sm:$0xff]  ;;  %v816_v21 = vld [vmem:[%s2387_s3 + $0xc8] sm:$0xff] }
 0x1ef   : > { %v827_v11 = vmul.f32 %v795_v51, %v758_v5  ;;  %v828_v26 = vmul.f32 %v796_v3, %v758_v5  ;;  %v829_v46 = vmul.f32 %v797_v7, %v758_v5  ;;  %v830_v10 = vmul.f32 %v798_v20, %v758_v5  ;;  %v817_v51 = vld [vmem:[%s2387_s3 + $0xd0] sm:$0xff]  ;;  %v818_v3 = vld [vmem:[%s2387_s3 + $0xd8] sm:$0xff]  ;;  %v819_v7 = vld [vmem:[%s2387_s3 + $0xe0] sm:$0xff] }
 0x1f0   : > { %v831_v63 = vmul.f32 %v799_v24, %v758_v5  ;;  %v832_v52 = vmul.f32 %v800_v40, %v758_v5  ;;  %v833_v15 = vmul.f32 %v801_v36, %v758_v5  ;;  %v834_v2 = vmul.f32 %v802_v48, %v758_v5  ;;  %v820_v48 = vld [vmem:[%s2387_s3 + $0xe8] sm:$0xff]  ;;  %v821_v36 = vld [vmem:[%s2387_s3 + $0xf0] sm:$0xff]  ;;  %v822_v24 = vld [vmem:[%s2387_s3 + $0xf8] sm:$0xff] }
 0x1f1   : > { %v835_v20 = vmul.f32 %v803_v37, %v758_v5  ;;  %v836_v43 = vmul.f32 %v804_v61, %v758_v5  ;;  %v837_v29 = vmul.f32 %v805_v59, %v758_v5  ;;  %v838_v6 = vmul.f32 %v806_v55, %v758_v5 }
 0x1f2   : > { %v839_v40 = vmul.f32 %v807_v42, %v758_v5  ;;  %v840_v0 = vmul.f32 %v808_v54, %v758_v5  ;;  %v841_v33 = vmul.f32 %v809_v30, %v758_v5  ;;  %v842_v12 = vmul.f32 %v810_v14, %v758_v5 }
 0x1f3   : > { %v843_v37 = vmul.f32 %v811_v57, %v758_v5  ;;  %v844_v61 = vmul.f32 %v812_v53, %v758_v5  ;;  %v845_v59 = vmul.f32 %v813_v45, %v758_v5  ;;  %v846_v55 = vmul.f32 %v814_v13, %v758_v5  ;;  %v2488_v13 = vld [vmem:[#allocation10_spill] sm:$0xff] }
 0x1f4   : > { %v847_v62 = vmul.f32 %v815_v9, %v758_v5  ;;  %v848_v35 = vmul.f32 %v816_v21, %v758_v5  ;;  %v849_v50 = vmul.f32 %v817_v51, %v758_v5  ;;  %v850_v31 = vmul.f32 %v818_v3, %v758_v5  ;;  %v2490_v21 = vld [vmem:[#allocation11_spill] sm:$0xff]  ;;  %v2494_v51 = vld [vmem:[#allocation2_spill] sm:$0xff]  ;;  %v2496_v3 = vld [vmem:[#allocation5_spill] sm:$0xff] }
 0x1f5   : > { %v851_v22 = vmul.f32 %v819_v7, %v758_v5  ;;  %v852_v16 = vmul.f32 %v820_v48, %v758_v5  ;;  %v853_v41 = vmul.f32 %v821_v36, %v758_v5  ;;  %v854_v4 = vmul.f32 %v822_v24, %v758_v5  ;;  %v2498_v48 = vld [vmem:[#allocation3_spill] sm:$0xff] }
 0x1f6   : > { %v855_v19 = vmul.f32 %v823_v23, %v2474_v60  ;;  %v2475_v42 = vsub.f32 %v1553_v38, %v1759_v25  ;;  %v2476_v45 = vsub.f32 %v1556_v39, %v1759_v25  ;;  %v2477_v14 = vsub.f32 %v1595_v56, %v1759_v25  ;;  %v2486_v60 = vld [vmem:[#allocation6_spill] sm:$0xff]  ;;  %v2500_v24 = vld [vmem:[#allocation7_spill] sm:$0xff] }
 0x1f7   : > { %v2478_v53 = vsub.f32 %v1598_v58, %v1759_v25  ;;  %v860_v23 = vmul.f32 %v828_v26, %v2479_v27  ;;  %v2480_v38 = vsub.f32 %v1643_v18, %v1759_v25  ;;  %v2481_v39 = vsub.f32 %v1661_v32, %v1759_v25 }
 0x1f8   : > { %v856_v30 = vmul.f32 %v824_v17, %v2475_v42  ;;  %v857_v54 = vmul.f32 %v825_v8, %v2476_v45  ;;  %v858_v57 = vmul.f32 %v826_v34, %v2477_v14  ;;  %v2482_v56 = vsub.f32 %v1538_v28, %v1759_v25  ;;  %v2502_v45 = vld [vmem:[#allocation8_spill] sm:$0xff] }
 0x1f9   : > { %v859_v5 = vmul.f32 %v827_v11, %v2478_v53  ;;  %v861_v17 = vmul.f32 %v829_v46, %v2480_v38  ;;  %v862_v8 = vmul.f32 %v830_v10, %v2481_v39  ;;  %v2483_v58 = vsub.f32 %v1564_v44, %v1759_v25  ;;  %v2504_v53 = vld [vmem:[#allocation9_spill] sm:$0xff]  ;;  %v2506_v38 = vld [vmem:[#allocation12_spill] sm:$0xff] }
 0x1fa   : > { %v863_v34 = vmul.f32 %v831_v63, %v2482_v56  ;;  %v865_v26 = vmul.f32 %v833_v15, %v2484_v1  ;;  %v2485_v18 = vsub.f32 %v2453_v47, %v1759_v25  ;;  %v2487_v32 = vsub.f32 %v2486_v60, %v1759_v25  ;;  %v2492_v63 = vld [vmem:[#allocation13_spill] sm:$0xff]  ;;  %v2508_v56 = vld [vmem:[#allocation19_spill] sm:$0xff]  ;;  %v2510_v1 = vld [vmem:[#allocation14_spill] sm:$0xff] }
 0x1fb   : > { %v864_v11 = vmul.f32 %v832_v52, %v2483_v58  ;;  %v2489_v28 = vsub.f32 %v2488_v13, %v1759_v25  ;;  %v2491_v44 = vsub.f32 %v2490_v21, %v1759_v25  ;;  %v2493_v49 = vsub.f32 %v2492_v63, %v1759_v25  ;;  %v2512_v60 = vld [vmem:[#allocation16_spill] sm:$0xff]  ;;  %v2514_v13 = vld [vmem:[#allocation15_spill] sm:$0xff]  ;;  %v2516_v21 = vld [vmem:[#allocation18_spill] sm:$0xff] }
 0x1fc   : > { %v866_v46 = vmul.f32 %v834_v2, %v2485_v18  ;;  %v867_v10 = vmul.f32 %v835_v20, %v2487_v32  ;;  %v2495_v47 = vsub.f32 %v2494_v51, %v1759_v25  ;;  %v2497_v7 = vsub.f32 %v2496_v3, %v1759_v25  ;;  %v2518_v63 = vld [vmem:[#allocation20_spill] sm:$0xff]  ;;  %v2520_v51 = vld [vmem:[#allocation17_spill] sm:$0xff] }
 0x1fd   : > { %v868_v9 = vmul.f32 %v836_v43, %v2489_v28  ;;  %v869_v52 = vmul.f32 %v837_v29, %v2491_v44  ;;  %v870_v15 = vmul.f32 %v838_v6, %v2493_v49  ;;  %v2499_v36 = vsub.f32 %v2498_v48, %v1759_v25  ;;  %v2522_v3 = vld [vmem:[#allocation21_spill] sm:$0xff] }
 0x1fe   : > { %v871_v2 = vmul.f32 %v839_v40, %v2495_v47  ;;  %v872_v20 = vmul.f32 %v840_v0, %v2497_v7  ;;  %v2501_v42 = vsub.f32 %v2500_v24, %v1759_v25  ;;  %v2503_v14 = vsub.f32 %v2502_v45, %v1759_v25  ;;  %v893_v24 = vld [vmem:[%s2388_s4 + $0x30] sm:$0xff]  ;;  %v895_v45 = vld [vmem:[%s2388_s4 + $0x40] sm:$0xff] }
 0x1ff   : > { %v873_v43 = vmul.f32 %v841_v33, %v2499_v36  ;;  %v2505_v27 = vsub.f32 %v2504_v53, %v1759_v25  ;;  %v2507_v39 = vsub.f32 %v2506_v38, %v1759_v25  ;;  %v2509_v58 = vsub.f32 %v2508_v56, %v1759_v25  ;;  %v897_v53 = vld [vmem:[%s2388_s4 + $0x50] sm:$0xff]  ;;  %v899_v38 = vld [vmem:[%s2388_s4 + $0x60] sm:$0xff] }
 0x200   : > { %v874_v29 = vmul.f32 %v842_v12, %v2501_v42  ;;  %v875_v6 = vmul.f32 %v843_v37, %v2503_v14  ;;  %v2511_v18 = vsub.f32 %v2510_v1, %v1759_v25  ;;  %v2513_v32 = vsub.f32 %v2512_v60, %v1759_v25  ;;  %v894_v42 = vld [vmem:[%s2388_s4 + $0x38] sm:$0xff]  ;;  %v896_v14 = vld [vmem:[%s2388_s4 + $0x48] sm:$0xff]  ;;  %v901_v56 = vld [vmem:[%s2388_s4 + $0x70] sm:$0xff] }
 0x201   : > { %v876_v40 = vmul.f32 %v844_v61, %v2505_v27  ;;  %v877_v0 = vmul.f32 %v845_v59, %v2507_v39  ;;  %v878_v33 = vmul.f32 %v846_v55, %v2509_v58  ;;  %v2515_v28 = vsub.f32 %v2514_v13, %v1759_v25  ;;  %v898_v27 = vld [vmem:[%s2388_s4 + $0x58] sm:$0xff]  ;;  %v900_v39 = vld [vmem:[%s2388_s4 + $0x68] sm:$0xff]  ;;  %v903_v1 = vld [vmem:[%s2388_s4 + $0x80] sm:$0xff] }
 0x202   : > { %v879_v12 = vmul.f32 %v847_v62, %v2511_v18  ;;  %v880_v37 = vmul.f32 %v848_v35, %v2513_v32  ;;  %v2517_v44 = vsub.f32 %v2516_v21, %v1759_v25  ;;  %v2519_v49 = vsub.f32 %v2518_v63, %v1759_v25  ;;  %v902_v58 = vld [vmem:[%s2388_s4 + $0x78] sm:$0xff]  ;;  %v904_v18 = vld [vmem:[%s2388_s4 + $0x88] sm:$0xff]  ;;  %v905_v60 = vld [vmem:[%s2388_s4 + $0x90] sm:$0xff] }
 0x203   : > { %v881_v61 = vmul.f32 %v849_v50, %v2515_v28  ;;  %v2521_v62 = vsub.f32 %v2520_v51, %v1759_v25  ;;  %v2523_v35 = vsub.f32 %v2522_v3, %v1759_v25  ;;  %v2524_v50 = vld [vmem:[#allocation22_spill] sm:$0xff]  ;;  %v909_v51 = vld [vmem:[%s2388_s4 + $0xb0] sm:$0xff] }
 0x204   : > { %v882_v59 = vmul.f32 %v850_v31, %v2517_v44  ;;  %v2011_v55 = vmul.f32 %v851_v22, %v2519_v49  ;;  %v2525_v48 = vsub.f32 %v2524_v50, %v1759_v25  ;;  %v887_v22 = vld [vmem:[%s2388_s4] sm:$0xff]  ;;  %v888_v31 = vld [vmem:[%s2388_s4 + $0x8] sm:$0xff]  ;;  %v906_v44 = vld [vmem:[%s2388_s4 + $0x98] sm:$0xff] }
 0x205   : > { %v2016_v47 = vmul.f32 %v852_v16, %v2521_v62  ;;  %v2021_v7 = vmul.f32 %v853_v41, %v2523_v35  ;;  %v889_v16 = vld [vmem:[%s2388_s4 + $0x10] sm:$0xff]  ;;  %v890_v41 = vld [vmem:[%s2388_s4 + $0x18] sm:$0xff]  ;;  %v891_v25 = vld [vmem:[%s2388_s4 + $0x20] sm:$0xff]  ;;  %v2085_v32 = vadd.f32 %v887_v22, %v855_v19  ;;  %v2087_v13 = vadd.f32 %v888_v31, %v856_v30 }
 0x206   : > { %v2026_v36 = vmul.f32 %v854_v4, %v2525_v48  ;;  %v892_v4 = vld [vmem:[%s2388_s4 + $0x28] sm:$0xff]  ;;  %v2089_v28 = vadd.f32 %v889_v16, %v857_v54  ;;  %v2091_v21 = vadd.f32 %v890_v41, %v858_v57  ;;  %v907_v63 = vld [vmem:[%s2388_s4 + $0xa0] sm:$0xff]  ;;  %v2102_v19 = vadd.f32 %v891_v25, %v859_v5  ;;  %v910_v62 = vld [vmem:[%s2388_s4 + $0xb8] sm:$0xff] }
 0x207   : > { %v908_v49 = vld [vmem:[%s2388_s4 + $0xa8] sm:$0xff]  ;;  %v2104_v30 = vadd.f32 %v892_v4, %v860_v23  ;;  %v2106_v54 = vadd.f32 %v893_v24, %v861_v17  ;;  %v2108_v57 = vadd.f32 %v894_v42, %v862_v8  ;;  %v911_v3 = vld [vmem:[%s2388_s4 + $0xc0] sm:$0xff]  ;;  %v2119_v5 = vadd.f32 %v895_v45, %v863_v34  ;;  %v913_v50 = vld [vmem:[%s2388_s4 + $0xd0] sm:$0xff] }
 0x208   : > { %v2121_v23 = vadd.f32 %v896_v14, %v864_v11  ;;  %v2123_v17 = vadd.f32 %v897_v53, %v865_v26  ;;  %v2125_v8 = vadd.f32 %v898_v27, %v866_v46  ;;  %v912_v35 = vld [vmem:[%s2388_s4 + $0xc8] sm:$0xff]  ;;  %v914_v48 = vld [vmem:[%s2388_s4 + $0xd8] sm:$0xff]  ;;  %v2136_v34 = vadd.f32 %v899_v38, %v867_v10  ;;  %v915_v22 = vld [vmem:[%s2388_s4 + $0xe0] sm:$0xff] }
 0x209   : > { %v2138_v11 = vadd.f32 %v900_v39, %v868_v9  ;;  %v2140_v26 = vadd.f32 %v901_v56, %v869_v52  ;;  %v2142_v46 = vadd.f32 %v902_v58, %v870_v15  ;;  %v916_v31 = vld [vmem:[%s2388_s4 + $0xe8] sm:$0xff]  ;;  %v2150_v16 = vadd.f32 %v903_v1, %v871_v2 }
 0x20a   : > { %v2152_v41 = vadd.f32 %v904_v18, %v872_v20  ;;  %v2154_v10 = vadd.f32 %v905_v60, %v873_v43  ;;  %v2156_v9 = vadd.f32 %v906_v44, %v874_v29  ;;  %v2158_v52 = vadd.f32 %v907_v63, %v875_v6  ;;  %v917_v43 = vld [vmem:[%s2388_s4 + $0xf0] sm:$0xff] }
 0x20b   : > { %v2160_v15 = vadd.f32 %v908_v49, %v876_v40  ;;  %v2162_v25 = vadd.f32 %v909_v51, %v877_v0  ;;  %v2164_v4 = vadd.f32 %v910_v62, %v878_v33  ;;  %v2166_v24 = vadd.f32 %v911_v3, %v879_v12  ;;  %v918_v40 = vld [vmem:[%s2388_s4 + $0xf8] sm:$0xff] }
 0x20c   : > { %v2168_v42 = vadd.f32 %v912_v35, %v880_v37  ;;  %v2170_v2 = vadd.f32 %v913_v50, %v881_v61  ;;  %v2172_v20 = vadd.f32 %v914_v48, %v882_v59  ;;  %v2178_v29 = vadd.f32 %v915_v22, %v2011_v55 }
 0x20d   : > { %v2181_v6 = vadd.f32 %v916_v31, %v2016_v47  ;;  %vm951_vm3 = vcmp.gt.f32.partialorder %v2085_v32, 0.0  ;;  %vm952_vm4 = vcmp.gt.f32.partialorder %v2087_v13, 0.0  ;;  %vm953_vm5 = vcmp.gt.f32.partialorder %v2089_v28, 0.0 }
 0x20e   : > { %vm954_vm6 = vcmp.gt.f32.partialorder %v2091_v21, 0.0  ;;  %vm955_vm7 = vcmp.gt.f32.partialorder %v2102_v19, 0.0  ;;  %vm956_vm8 = vcmp.gt.f32.partialorder %v2104_v30, 0.0  ;;  %vm957_vm9 = vcmp.gt.f32.partialorder %v2106_v54, 0.0 }
 0x20f   : > { %vm958_vm10 = vcmp.gt.f32.partialorder %v2108_v57, 0.0  ;;  %vm959_vm11 = vcmp.gt.f32.partialorder %v2119_v5, 0.0  ;;  %v2197_v0 = vadd.f32 %v917_v43, %v2021_v7  ;;  %v983_v33 = vmul.f32 0.01, %v2085_v32 }
 0x210   : > { %v984_v12 = vmul.f32 0.01, %v2087_v13  ;;  %v985_v37 = vmul.f32 0.01, %v2089_v28  ;;  %v2207_v61 = vadd.f32 %v918_v40, %v2026_v36  ;;  %vm966_vm2 = vcmp.gt.f32.partialorder %v2142_v46, 0.0 }
 0x211   : > { %vm967_vm13 = vcmp.gt.f32.partialorder %v2150_v16, 0.0  ;;  %v986_v59 = vmul.f32 0.01, %v2091_v21  ;;  %v987_v55 = vmul.f32 0.01, %v2102_v19  ;;  %vm972_vm1 = vcmp.gt.f32.partialorder %v2160_v15, 0.0 }
 0x212   : > { %v988_v47 = vmul.f32 0.01, %v2104_v30  ;;  %v989_v7 = vmul.f32 0.01, %v2106_v54  ;;  %v990_v36 = vmul.f32 0.01, %v2108_v57  ;;  %v2226_v14 = vsel %vm951_vm3, %v2085_v32, %v983_v33 }
 0x213   : > { %v991_v45 = vmul.f32 0.01, %v2119_v5  ;;  %vm976_vm12 = vcmp.gt.f32.partialorder %v2168_v42, 0.0  ;;  %v992_v53 = vmul.f32 0.01, %v2121_v23  ;;  %v2238_v39 = vsel %vm952_vm4, %v2087_v13, %v984_v12 }
 0x214   : > { %v993_v27 = vmul.f32 0.01, %v2123_v17  ;;  %v994_v38 = vmul.f32 0.01, %v2125_v8  ;;  %vm978_vm14 = vcmp.gt.f32.partialorder %v2172_v20, 0.0  ;;  %vm979_vm0 = vcmp.gt.f32.partialorder %v2178_v29, 0.0 }
 0x215   : > { %vm980_vm15 = vcmp.gt.f32.partialorder %v2181_v6, 0.0  ;;  %v995_v56 = vmul.f32 0.01, %v2136_v34  ;;  %v996_v58 = vmul.f32 0.01, %v2138_v11  ;;  %v1017_v18 = vsel %vm953_vm5, %v2089_v28, %v985_v37 }
 0x216   : > { %v997_v1 = vmul.f32 0.01, %v2140_v26  ;;  %vm981_vm4 = vcmp.gt.f32.partialorder %v2197_v0, 0.0  ;;  %vm982_vm3 = vcmp.gt.f32.partialorder %v2207_v61, 0.0  ;;  %v998_v60 = vmul.f32 0.01, %v2142_v46 }
 0x217   : > { %v999_v32 = vmul.f32 0.01, %v2150_v16  ;;  %v1000_v13 = vmul.f32 0.01, %v2152_v41  ;;  %v1018_v44 = vsel %vm954_vm6, %v2091_v21, %v986_v59  ;;  %v1001_v63 = vmul.f32 0.01, %v2154_v10 }
 0x218   : > { %v1002_v49 = vmul.f32 0.01, %v2156_v9  ;;  %v1003_v28 = vmul.f32 0.01, %v2158_v52  ;;  %v1019_v51 = vsel %vm955_vm7, %v2102_v19, %v987_v55  ;;  %v1004_v62 = vmul.f32 0.01, %v2160_v15 }
 0x219   : > { %v1005_v3 = vmul.f32 0.01, %v2162_v25  ;;  %v1006_v35 = vmul.f32 0.01, %v2164_v4  ;;  %v1020_v21 = vsel %vm956_vm8, %v2104_v30, %v988_v47  ;;  %v1007_v50 = vmul.f32 0.01, %v2166_v24 }
 0x21a   : > { %v1008_v48 = vmul.f32 0.01, %v2168_v42  ;;  %v1009_v22 = vmul.f32 0.01, %v2170_v2  ;;  %v1021_v19 = vsel %vm957_vm9, %v2106_v54, %v989_v7  ;;  %v1010_v31 = vmul.f32 0.01, %v2172_v20 }
 0x21b   : > { %v1011_v43 = vmul.f32 0.01, %v2178_v29  ;;  %v1012_v40 = vmul.f32 0.01, %v2181_v6  ;;  %v1022_v30 = vsel %vm958_vm10, %v2108_v57, %v990_v36  ;;  %v1013_v33 = vmul.f32 0.01, %v2197_v0 }
 0x21c   : > { %v1014_v12 = vmul.f32 0.01, %v2207_v61  ;;  %v1023_v37 = vsel %vm959_vm11, %v2119_v5, %v991_v45  ;;  %vm2526_vm5 = vcmp.gt.f32.partialorder %v2121_v23, 0.0  ;;  %vm2527_vm6 = vcmp.gt.f32.partialorder %v2123_v17, 0.0 }
 0x21d   : > { %v1024_v54 = vsel %vm2526_vm5, %v2121_v23, %v992_v53  ;;  %v1025_v59 = vsel %vm2527_vm6, %v2123_v17, %v993_v27  ;;  %vm2528_vm7 = vcmp.gt.f32.partialorder %v2125_v8, 0.0  ;;  %vm2529_vm8 = vcmp.gt.f32.partialorder %v2136_v34, 0.0 }
 0x21e   : > { %v1026_v57 = vsel %vm2528_vm7, %v2125_v8, %v994_v38  ;;  %v1027_v55 = vsel %vm2529_vm8, %v2136_v34, %v995_v56  ;;  %vm2530_vm9 = vcmp.gt.f32.partialorder %v2138_v11, 0.0  ;;  %vm2531_vm10 = vcmp.gt.f32.partialorder %v2140_v26, 0.0 }
 0x21f   : > { %v1028_v5 = vsel %vm2530_vm9, %v2138_v11, %v996_v58  ;;  %v1029_v23 = vsel %vm2531_vm10, %v2140_v26, %v997_v1  ;;  %v1030_v17 = vsel %vm966_vm2, %v2142_v46, %v998_v60  ;;  %v1031_v8 = vsel %vm967_vm13, %v2150_v16, %v999_v32 }
 0x220   : > { %vm2532_vm11 = vcmp.gt.f32.partialorder %v2152_v41, 0.0  ;;  %vm2533_vm5 = vcmp.gt.f32.partialorder %v2154_v10, 0.0  ;;  %vm2534_vm6 = vcmp.gt.f32.partialorder %v2156_v9, 0.0  ;;  %vm2535_vm7 = vcmp.gt.f32.partialorder %v2158_v52, 0.0 }
 0x221   : > { %v1032_v34 = vsel %vm2532_vm11, %v2152_v41, %v1000_v13  ;;  %v1033_v11 = vsel %vm2533_vm5, %v2154_v10, %v1001_v63  ;;  %v1034_v26 = vsel %vm2534_vm6, %v2156_v9, %v1002_v49  ;;  %v1035_v46 = vsel %vm2535_vm7, %v2158_v52, %v1003_v28 }
 0x222   : > { %v1036_v16 = vsel %vm972_vm1, %v2160_v15, %v1004_v62  ;;  %vm2536_vm13 = vcmp.gt.f32.partialorder %v2162_v25, 0.0  ;;  %vm2537_vm2 = vcmp.gt.f32.partialorder %v2164_v4, 0.0  ;;  %vm2538_vm8 = vcmp.gt.f32.partialorder %v2166_v24, 0.0 }
 0x223   : > { %v1037_v41 = vsel %vm2536_vm13, %v2162_v25, %v1005_v3  ;;  %v1038_v10 = vsel %vm2537_vm2, %v2164_v4, %v1006_v35  ;;  %v1039_v9 = vsel %vm2538_vm8, %v2166_v24, %v1007_v50  ;;  %v1040_v52 = vsel %vm976_vm12, %v2168_v42, %v1008_v48 }
 0x224   : > { %vm2539_vm1 = vcmp.gt.f32.partialorder %v2170_v2, 0.0  ;;  %v1042_v25 = vsel %vm978_vm14, %v2172_v20, %v1010_v31  ;;  %v1043_v4 = vsel %vm979_vm0, %v2178_v29, %v1011_v43  ;;  %v1044_v24 = vsel %vm980_vm15, %v2181_v6, %v1012_v40 }
 0x225   : > { %v1041_v15 = vsel %vm2539_vm1, %v2170_v2, %v1009_v22  ;;  %v1045_v42 = vsel %vm981_vm4, %v2197_v0, %v1013_v33  ;;  %v1046_v2 = vsel %vm982_vm3, %v2207_v61, %v1014_v12  ;;  %v1302_v20 = vpack.c.bf16 %v2238_v39, %v2226_v14 }
 0x226   : > { %v1307_v47 = vpack.c.bf16 %v1018_v44, %v1017_v18  ;;  %v1312_v7 = vpack.c.bf16 %v1020_v21, %v1019_v51  ;;  %v1317_v36 = vpack.c.bf16 %v1022_v30, %v1021_v19  ;;  %v1322_v29 = vpack.c.bf16 %v1024_v54, %v1023_v37 }
 0x227   : > { %v1327_v45 = vpack.c.bf16 %v1026_v57, %v1025_v59  ;;  %1303 = vst [vmem:[%s2343_s15] sm:$0xff] %v1302_v20   ;;  %v1332_v6 = vpack.c.bf16 %v1028_v5, %v1027_v55  ;;  %v1337_v0 = vpack.c.bf16 %v1030_v17, %v1029_v23  ;;  %v1342_v53 = vpack.c.bf16 %v1032_v34, %v1031_v8 }
 0x228   : > { %v1347_v61 = vpack.c.bf16 %v1034_v26, %v1033_v11  ;;  %1379 = vst [vmem:[%s2343_s15 + $0x8] sm:$0xff] %v1307_v47   ;;  %v1352_v14 = vpack.c.bf16 %v1036_v16, %v1035_v46  ;;  %v1357_v27 = vpack.c.bf16 %v1038_v10, %v1037_v41  ;;  %v1362_v38 = vpack.c.bf16 %v1040_v52, %v1039_v9 }
 0x229   : > { %v1367_v39 = vpack.c.bf16 %v1042_v25, %v1041_v15  ;;  %1380 = vst [vmem:[%s2343_s15 + $0x10] sm:$0xff] %v1312_v7   ;;  %v1372_v56 = vpack.c.bf16 %v1044_v24, %v1043_v4  ;;  %v1377_v58 = vpack.c.bf16 %v1046_v2, %v1045_v42 }
 0x22a   : > { %1381 = vst [vmem:[%s2343_s15 + $0x18] sm:$0xff] %v1317_v36  }
 0x22b   : > { %1382 = vst [vmem:[%s2343_s15 + $0x20] sm:$0xff] %v1322_v29  }
 0x22c   : > { %1383 = vst [vmem:[%s2343_s15 + $0x28] sm:$0xff] %v1327_v45  }
 0x22d   : > { %1384 = vst [vmem:[%s2343_s15 + $0x30] sm:$0xff] %v1332_v6  }
 0x22e   : > { %1385 = vst [vmem:[%s2343_s15 + $0x38] sm:$0xff] %v1337_v0  }
 0x22f   : > { %1386 = vst [vmem:[%s2343_s15 + $0x40] sm:$0xff] %v1342_v53  }
 0x230   : > { %1387 = vst [vmem:[%s2343_s15 + $0x48] sm:$0xff] %v1347_v61  }
 0x231   : > { %1388 = vst [vmem:[%s2343_s15 + $0x50] sm:$0xff] %v1352_v14  }
 0x232   : > { %1389 = vst [vmem:[%s2343_s15 + $0x58] sm:$0xff] %v1357_v27  }
 0x233   : > { %1390 = vst [vmem:[%s2343_s15 + $0x60] sm:$0xff] %v1362_v38  }
 0x234   : > { %1391 = vst [vmem:[%s2343_s15 + $0x68] sm:$0xff] %v1367_v39  }
 0x235   : > { %1392 = vst [vmem:[%s2343_s15 + $0x70] sm:$0xff] %v1372_v56  }
 0x236   : > { %1393 = vst [vmem:[%s2343_s15 + $0x78] sm:$0xff] %v1377_v58  }
 0x237 PF: > { %s15_s18 = sadd.s32 1, %s1435_s18  }
 0x238   : > { %p12_p4 = scmp.ge.s32.totalorder %s15_s18, 4  }
 0x23a   :  { %14 = sbr.rel (!%p12_p4) target bundleno = 1 (0x1), region = 70 }

// kernel: a_call__.3
= control target key start
LH: loop header
LB: loop body
LE: loop exit
PB: predicated region body
PF: predicated region fallthrough
CT: control target
= control target key end

     0   :  { %s1050_s1 = inlined_call_operand.vmem [shape: bf16[128,128], index: 1, kind: input, shape index: {}]   ;;  %s1051_s2 = inlined_call_operand.vmem [shape: f32[1,128], index: 2, kind: input, shape index: {}]   ;;  %s1052_s0 = inlined_call_operand.vmem [shape: bf16[2,64,128], index: 0, kind: input, shape index: {}]   ;;  %s1053_s3 = inlined_call_operand.vmem [shape: f32[64,128], index: 3, kind: input, shape index: {}]   ;;  %s1054_s4 = inlined_call_operand.vmem [shape: f32[64,128], index: 4, kind: input, shape index: {}]   ;;  %s1055_s5 = inlined_call_operand.vmem [shape: f32[2,64,128], index: 5, kind: output, shape index: {}]  }
   0x1   :  { %v590_v0 = vld [vmem:[%s1050_s1 + $0x38] sm:$0xff]  ;;  %v589_v1 = vld [vmem:[%s1050_s1 + $0x30] sm:$0xff]  ;;  %v588_v2 = vld [vmem:[%s1050_s1 + $0x28] sm:$0xff] }
   0x2   :  { %152 = vmatpush.bf16.msra.mxu0 %v590_v0  ;;  %591 = vmatpush.bf16.msra.mxu1 %v590_v0  ;;  %v587_v3 = vld [vmem:[%s1050_s1 + $0x20] sm:$0xff]  ;;  %v586_v4 = vld [vmem:[%s1050_s1 + $0x18] sm:$0xff]  ;;  %v585_v5 = vld [vmem:[%s1050_s1 + $0x10] sm:$0xff] }
   0x3   :  { %592 = vmatpush.bf16.msra.mxu2 %v590_v0  ;;  %593 = vmatpush.bf16.msra.mxu3 %v590_v0  ;;  %v584_v6 = vld [vmem:[%s1050_s1 + $0x8] sm:$0xff]  ;;  %v583_v7 = vld [vmem:[%s1050_s1] sm:$0xff]  ;;  %v577_v9 = vld [vmem:[%s1052_s0 + $0x10] sm:$0xff] }
   0x4   :  { %v575_v8 = vld [vmem:[%s1052_s0] sm:$0xff]  ;;  %v581_v11 = vld [vmem:[%s1052_s0 + $0x30] sm:$0xff]  ;;  %v576_v12 = vld [vmem:[%s1052_s0 + $0x8] sm:$0xff] }
   0x5   :  { %v579_v10 = vld [vmem:[%s1052_s0 + $0x20] sm:$0xff]  ;;  %v578_v13 = vld [vmem:[%s1052_s0 + $0x18] sm:$0xff]  ;;  %v580_v14 = vld [vmem:[%s1052_s0 + $0x28] sm:$0xff] }
   0x6   :  { %153 = vmatpush.bf16.msra.mxu0 %v589_v1  ;;  %594 = vmatpush.bf16.msra.mxu1 %v589_v1  ;;  %v582_v15 = vld [vmem:[%s1052_s0 + $0x38] sm:$0xff]  ;;  %v701_v16 = vld [vmem:[%s1051_s2] ss:$0 sm:$0xff] }
   0x7   :  { %595 = vmatpush.bf16.msra.mxu2 %v589_v1  ;;  %596 = vmatpush.bf16.msra.mxu3 %v589_v1 }
   0xa   :  { %154 = vmatpush.bf16.msra.mxu0 %v588_v2  ;;  %597 = vmatpush.bf16.msra.mxu1 %v588_v2 }
   0xb   :  { %598 = vmatpush.bf16.msra.mxu2 %v588_v2  ;;  %599 = vmatpush.bf16.msra.mxu3 %v588_v2 }
   0xe   :  { %155 = vmatpush.bf16.msra.mxu0 %v587_v3  ;;  %600 = vmatpush.bf16.msra.mxu1 %v587_v3 }
   0xf   :  { %601 = vmatpush.bf16.msra.mxu2 %v587_v3  ;;  %602 = vmatpush.bf16.msra.mxu3 %v587_v3 }
  0x12   :  { %156 = vmatpush.bf16.msra.mxu0 %v586_v4  ;;  %603 = vmatpush.bf16.msra.mxu1 %v586_v4 }
  0x13   :  { %604 = vmatpush.bf16.msra.mxu2 %v586_v4  ;;  %605 = vmatpush.bf16.msra.mxu3 %v586_v4 }
  0x16   :  { %157 = vmatpush.bf16.msra.mxu0 %v585_v5  ;;  %606 = vmatpush.bf16.msra.mxu1 %v585_v5 }
  0x17   :  { %607 = vmatpush.bf16.msra.mxu2 %v585_v5  ;;  %608 = vmatpush.bf16.msra.mxu3 %v585_v5 }
  0x1a   :  { %158 = vmatpush.bf16.msra.mxu0 %v584_v6  ;;  %609 = vmatpush.bf16.msra.mxu1 %v584_v6 }
  0x1b   :  { %610 = vmatpush.bf16.msra.mxu2 %v584_v6  ;;  %611 = vmatpush.bf16.msra.mxu3 %v584_v6 }
  0x1e   :  { %159 = vmatpush.bf16.msra.mxu0 %v583_v7  ;;  %612 = vmatpush.bf16.msra.mxu1 %v583_v7 }
  0x1f   :  { %613 = vmatpush.bf16.msra.mxu2 %v583_v7  ;;  %614 = vmatpush.bf16.msra.mxu3 %v583_v7 }
  0x21   :  { %160 = vmatmul.bf16.vlgmr.msra.gmra.mxu0 %v575_v8  ;;  %170 = vmatmul.bf16.vlgmr.msra.gmra.mxu1 %v577_v9 }
  0x22   :  { %180 = vmatmul.bf16.vlgmr.msra.gmra.mxu2 %v579_v10  ;;  %190 = vmatmul.bf16.vlgmr.msra.gmra.mxu3 %v581_v11 }
  0x31   :  { %165 = vmatmul.bf16.gmra.mxu0 %v576_v12  ;;  %175 = vmatmul.bf16.gmra.mxu1 %v578_v13 }
  0x32   :  { %185 = vmatmul.bf16.gmra.mxu2 %v580_v14  ;;  %195 = vmatmul.bf16.gmra.mxu3 %v582_v15 }
  0x9e   :  { %v161_v17 = vpop.f32.mrf.mxu0  ;;  %v171_v18 = vpop.f32.mrf.mxu1 }
  0x9f   :  { %v704_v19 = vadd.f32 %v701_v16, %v161_v17  ;;  %v707_v20 = vadd.f32 %v701_v16, %v171_v18 }
  0xa1   :  { %209 = vadd.xlane.f32.xlu2 %v707_v20  ;;  %201 = vadd.xlane.f32.xlu0 %v704_v19  ;;  %v263_v22 = vmul.f32 %v707_v20, %v707_v20  ;;  %v259_v25 = vmul.f32 %v704_v19, %v704_v19 }
  0xa5   :  { %v181_v21 = vpop.f32.mrf.mxu2  ;;  %v191_v27 = vpop.f32.mrf.mxu3 }
  0xa6   :  { %v714_v23 = vadd.f32 %v701_v16, %v181_v21  ;;  %v163_v24 = vpop.f32.mrf.mxu0  ;;  %v723_v28 = vadd.f32 %v701_v16, %v191_v27  ;;  %v173_v35 = vpop.f32.mrf.mxu1 }
  0xa7   :  { %v720_v26 = vadd.f32 %v701_v16, %v163_v24  ;;  %v746_v40 = vadd.f32 %v701_v16, %v173_v35 }
  0xa8   :  { %217 = vadd.xlane.f32.xlu1 %v714_v23  ;;  %v267_v30 = vmul.f32 %v714_v23, %v714_v23  ;;  %v271_v45 = vmul.f32 %v723_v28, %v723_v28 }
  0xa9   :  { %283 = vadd.xlane.f32.xlu2 %v263_v22  ;;  %275 = vadd.xlane.f32.xlu0 %v259_v25  ;;  %v260_v29 = vmul.f32 %v720_v26, %v720_v26  ;;  %v264_v49 = vmul.f32 %v746_v40, %v746_v40 }
  0xad   :  { %v183_v31 = vpop.f32.mrf.mxu2  ;;  %v193_v36 = vpop.f32.mrf.mxu3 }
  0xae   :  { %v166_v32 = vpop.f32.mrf.mxu0  ;;  %v734_v34 = vadd.f32 %v701_v16, %v183_v31  ;;  %v743_v39 = vadd.f32 %v701_v16, %v193_v36  ;;  %v176_v41 = vpop.f32.mrf.mxu1 }
  0xaf   :  { %v731_v33 = vadd.f32 %v701_v16, %v166_v32  ;;  %v752_v43 = vadd.f32 %v701_v16, %v176_v41 }
  0xb0   :  { %277 = vadd.xlane.f32.xlu1 %v260_v29  ;;  %v272_v47 = vmul.f32 %v743_v39, %v743_v39  ;;  %v268_v53 = vmul.f32 %v734_v34, %v734_v34 }
  0xb1   :  { %291 = vadd.xlane.f32.xlu2 %v267_v30  ;;  %225 = vadd.xlane.f32.xlu0 %v723_v28  ;;  %v265_v51 = vmul.f32 %v752_v43, %v752_v43  ;;  %v261_v57 = vmul.f32 %v731_v33, %v731_v33 }
  0xb5   :  { %v186_v37 = vpop.f32.mrf.mxu2  ;;  %v196_v42 = vpop.f32.mrf.mxu3 }
  0xb6   :  { %v740_v38 = vadd.f32 %v701_v16, %v186_v37  ;;  %v755_v44 = vadd.f32 %v701_v16, %v196_v42  ;;  %v178_v46 = vpop.f32.mrf.mxu1  ;;  %v168_v54 = vpop.f32.mrf.mxu0 }
  0xb7   :  { %v764_v48 = vadd.f32 %v701_v16, %v178_v46  ;;  %v778_v55 = vadd.f32 %v701_v16, %v168_v54 }
  0xb8   :  { %219 = vadd.xlane.f32.xlu1 %v734_v34  ;;  %v269_v59 = vmul.f32 %v740_v38, %v740_v38  ;;  %v273_v61 = vmul.f32 %v755_v44, %v755_v44 }
  0xb9   :  { %205 = vadd.xlane.f32.xlu2 %v731_v33  ;;  %203 = vadd.xlane.f32.xlu0 %v720_v26  ;;  %v262_v62 = vmul.f32 %v778_v55, %v778_v55  ;;  %v266_v63 = vmul.f32 %v764_v48, %v764_v48 }
  0xbd   :  { %v188_v50 = vpop.f32.mrf.mxu2  ;;  %v198_v58 = vpop.f32.mrf.mxu3 }
  0xbe   :  { %v772_v52 = vadd.f32 %v701_v16, %v188_v50  ;;  %v788_v60 = vadd.f32 %v701_v16, %v198_v58 }
  0xc0   :  { %227 = vadd.xlane.f32.xlu1 %v743_v39  ;;  %v270_v56 = vmul.f32 %v772_v52, %v772_v52  ;;  %v274_v0 = vmul.f32 %v788_v60, %v788_v60 }
  0xc1   :  { %221 = vadd.xlane.f32.xlu2 %v740_v38  ;;  %211 = vadd.xlane.f32.xlu0 %v746_v40 }
  0xc8   :  { %213 = vadd.xlane.f32.xlu1 %v752_v43 }
  0xc9   :  { %229 = vadd.xlane.f32.xlu2 %v755_v44  ;;  %299 = vadd.xlane.f32.xlu0 %v271_v45 }
  0xd0   :  { %301 = vadd.xlane.f32.xlu1 %v272_v47 }
  0xd1   :  { %215 = vadd.xlane.f32.xlu2 %v764_v48  ;;  %285 = vadd.xlane.f32.xlu0 %v264_v49 }
  0xd8   :  { %287 = vadd.xlane.f32.xlu1 %v265_v51 }
  0xd9   :  { %223 = vadd.xlane.f32.xlu2 %v772_v52  ;;  %293 = vadd.xlane.f32.xlu0 %v268_v53 }
  0xe0   :  { %207 = vadd.xlane.f32.xlu1 %v778_v55 }
  0xe1   :  { %297 = vadd.xlane.f32.xlu2 %v270_v56  ;;  %279 = vadd.xlane.f32.xlu0 %v261_v57 }
  0xe8   :  { %295 = vadd.xlane.f32.xlu1 %v269_v59 }
  0xe9   :  { %303 = vadd.xlane.f32.xlu2 %v273_v61  ;;  %231 = vadd.xlane.f32.xlu0 %v788_v60 }
  0xf0   :  { %281 = vadd.xlane.f32.xlu1 %v262_v62 }
  0xf1   :  { %289 = vadd.xlane.f32.xlu0 %v266_v63 }
  0xf8   :  { %305 = vadd.xlane.f32.xlu1 %v274_v0 }
 0x114   :  { %v210_v1 = vpop.xlane.xlu2 %209  ;;  %v202_v2 = vpop.xlane.xlu0 %201 }
 0x11b   :  { %v218_v3 = vpop.xlane.xlu1 %217 }
 0x11c   :  { %v284_v4 = vpop.xlane.xlu2 %283  ;;  %v276_v5 = vpop.xlane.xlu0 %275 }
 0x123   :  { %v278_v6 = vpop.xlane.xlu1 %277 }
 0x124   :  { %v292_v7 = vpop.xlane.xlu2 %291  ;;  %v226_v8 = vpop.xlane.xlu0 %225  ;;  %v307_v61 = vadd.f32 %v278_v6, %v276_v5 }
 0x12b   :  { %v220_v9 = vpop.xlane.xlu1 %219 }
 0x12c   :  { %v206_v10 = vpop.xlane.xlu2 %205  ;;  %v204_v11 = vpop.xlane.xlu0 %203  ;;  %v246_v24 = vadd.f32 %v220_v9, %v218_v3 }
 0x12d   :  { %v233_v32 = vadd.f32 %v204_v11, %v202_v2 }
 0x12f   :  { %v234_v36 = vadd.f32 %v233_v32, %v206_v10 }
 0x133   :  { %v228_v12 = vpop.xlane.xlu1 %227 }
 0x134   :  { %v222_v13 = vpop.xlane.xlu2 %221  ;;  %v212_v14 = vpop.xlane.xlu0 %211 }
 0x135   :  { %v247_v25 = vadd.f32 %v246_v24, %v222_v13 }
 0x13b   :  { %v214_v15 = vpop.xlane.xlu1 %213 }
 0x13c   :  { %v230_v16 = vpop.xlane.xlu2 %229  ;;  %v300_v17 = vpop.xlane.xlu0 %299 }
 0x143   :  { %v302_v18 = vpop.xlane.xlu1 %301 }
 0x144   :  { %v216_v21 = vpop.xlane.xlu2 %215  ;;  %v286_v22 = vpop.xlane.xlu0 %285 }
 0x14b   :  { %v288_v27 = vpop.xlane.xlu1 %287 }
 0x14c   :  { %v224_v29 = vpop.xlane.xlu2 %223  ;;  %v294_v30 = vpop.xlane.xlu0 %293 }
 0x14d   :  { %v248_v31 = vadd.f32 %v247_v25, %v224_v29  ;;  %v320_v49 = vadd.f32 %v294_v30, %v292_v7 }
 0x14f   :  { %v249_v35 = vadd.f32 %v248_v31, %v226_v8 }
 0x151   :  { %v250_v46 = vadd.f32 %v249_v35, %v228_v12 }
 0x153   :  { %v208_v37 = vpop.xlane.xlu1 %207  ;;  %v251_v53 = vadd.f32 %v250_v46, %v230_v16 }
 0x154   :  { %v235_v41 = vadd.f32 %v234_v36, %v208_v37  ;;  %v280_v42 = vpop.xlane.xlu0 %279  ;;  %v298_v59 = vpop.xlane.xlu2 %297 }
 0x155   :  { %v308_v2 = vadd.f32 %v307_v61, %v280_v42 }
 0x156   :  { %v236_v45 = vadd.f32 %v235_v41, %v210_v1 }
 0x158   :  { %v237_v47 = vadd.f32 %v236_v45, %v212_v14 }
 0x15a   :  { %v238_v50 = vadd.f32 %v237_v47, %v214_v15 }
 0x15b   :  { %v296_v51 = vpop.xlane.xlu1 %295 }
 0x15c   :  { %v239_v54 = vadd.f32 %v238_v50, %v216_v21  ;;  %v321_v56 = vadd.f32 %v320_v49, %v296_v51  ;;  %v232_v57 = vpop.xlane.xlu0 %231  ;;  %v304_v16 = vpop.xlane.xlu2 %303 }
 0x15d   :  { %v252_v58 = vadd.f32 %v251_v53, %v232_v57 }
 0x15e   :  { %v240_v62 = vrot.slane %v239_v54, 4  ;;  %v322_v63 = vadd.f32 %v321_v56, %v298_v59 }
 0x15f   :  { %v253_v0 = vrot.slane %v252_v58, 4 }
 0x160   :  { %v241_v8 = vadd.f32 %v240_v62, %v239_v54  ;;  %v323_v9 = vadd.f32 %v322_v63, %v300_v17 }
 0x161   :  { %v254_v1 = vadd.f32 %v253_v0, %v252_v58 }
 0x162   :  { %v242_v7 = vrot.slane %v241_v8, 2  ;;  %v324_v12 = vadd.f32 %v323_v9, %v302_v18 }
 0x163   :  { %v282_v3 = vpop.xlane.xlu1 %281  ;;  %v255_v13 = vrot.slane %v254_v1, 2 }
 0x164   :  { %v309_v10 = vadd.f32 %v308_v2, %v282_v3  ;;  %v243_v24 = vadd.f32 %v242_v7, %v241_v8  ;;  %v325_v25 = vadd.f32 %v324_v12, %v304_v16  ;;  %v290_v6 = vpop.xlane.xlu0 %289 }
 0x165   :  { %v256_v5 = vadd.f32 %v255_v13, %v254_v1 }
 0x166   :  { %v310_v11 = vadd.f32 %v309_v10, %v284_v4  ;;  %v244_v31 = vrot.slane %v243_v24, 1 }
 0x167   :  { %v257_v32 = vrot.slane %v256_v5, 1 }
 0x168   :  { %v311_v14 = vadd.f32 %v310_v11, %v286_v22  ;;  %v245_v4 = vadd.f32 %v244_v31, %v243_v24  ;;  %v858_v24 = vld [vmem:[%s1053_s3 + $0x20] sm:$0xff]  ;;  %v877_v31 = vld [vmem:[%s1053_s3 + $0x38] sm:$0xff] }
 0x169   :  { %v258_v41 = vadd.f32 %v257_v32, %v256_v5 }
 0x16a   :  { %v312_v15 = vadd.f32 %v311_v14, %v288_v27  ;;  %v799_v45 = vmul.f32 0.001953125, %v245_v4 }
 0x16b   :  { %v306_v21 = vpop.xlane.xlu1 %305  ;;  %v801_v46 = vmul.f32 0.001953125, %v258_v41  ;;  %v894_v41 = vld [vmem:[%s1054_s4] sm:$0xff] }
 0x16c   :  { %v313_v29 = vadd.f32 %v312_v15, %v290_v6  ;;  %v326_v30 = vadd.f32 %v325_v25, %v306_v21  ;;  %v337_v53 = vmul.f32 %v799_v45, %v799_v45  ;;  %v363_v1 = vsub.f32 %v704_v19, %v799_v45  ;;  %v853_v21 = vld [vmem:[%s1053_s3 + $0x18] sm:$0xff]  ;;  %v863_v25 = vld [vmem:[%s1053_s3 + $0x28] sm:$0xff] }
 0x16d   :  { %v338_v57 = vmul.f32 %v801_v46, %v801_v46  ;;  %v364_v10 = vsub.f32 %v720_v26, %v799_v45  ;;  %v365_v7 = vsub.f32 %v731_v33, %v799_v45  ;;  %v366_v12 = vsub.f32 %v778_v55, %v799_v45  ;;  %v834_v33 = vld [vmem:[%s1053_s3] sm:$0xff] }
 0x16e   :  { %v314_v35 = vrot.slane %v313_v29, 4  ;;  %v327_v17 = vrot.slane %v326_v30, 4  ;;  %v367_v13 = vsub.f32 %v707_v20, %v799_v45  ;;  %v368_v15 = vsub.f32 %v746_v40, %v799_v45  ;;  %v839_v20 = vld [vmem:[%s1053_s3 + $0x8] sm:$0xff]  ;;  %v844_v40 = vld [vmem:[%s1053_s3 + $0x10] sm:$0xff] }
 0x16f   :  { %v369_v19 = vsub.f32 %v752_v43, %v799_v45  ;;  %v370_v26 = vsub.f32 %v764_v48, %v799_v45  ;;  %v371_v55 = vsub.f32 %v714_v23, %v801_v46  ;;  %v372_v48 = vsub.f32 %v734_v34, %v801_v46 }
 0x170   :  { %v315_v36 = vadd.f32 %v314_v35, %v313_v29  ;;  %v328_v37 = vadd.f32 %v327_v17, %v326_v30  ;;  %v373_v6 = vsub.f32 %v740_v38, %v801_v46  ;;  %v374_v29 = vsub.f32 %v772_v52, %v801_v46  ;;  %v872_v30 = vld [vmem:[%s1053_s3 + $0x30] sm:$0xff] }
 0x171   :  { %v375_v32 = vsub.f32 %v723_v28, %v801_v46  ;;  %v376_v35 = vsub.f32 %v743_v39, %v801_v46  ;;  %v1056_v38 = vsub.f32 %v755_v44, %v801_v46  ;;  %v1057_v52 = vsub.f32 %v788_v60, %v801_v46 }
 0x172   :  { %v316_v18 = vrot.slane %v315_v36, 2  ;;  %v329_v42 = vrot.slane %v328_v37, 2 }
 0x174   :  { %v317_v22 = vadd.f32 %v316_v18, %v315_v36  ;;  %v330_v27 = vadd.f32 %v329_v42, %v328_v37  ;;  %v899_v18 = vld [vmem:[%s1054_s4 + $0x8] sm:$0xff] }
 0x176   :  { %v318_v47 = vrot.slane %v317_v22, 1  ;;  %v331_v49 = vrot.slane %v330_v27, 1 }
 0x178   :  { %v319_v50 = vadd.f32 %v318_v47, %v317_v22  ;;  %v332_v51 = vadd.f32 %v331_v49, %v330_v27  ;;  %v908_v47 = vld [vmem:[%s1054_s4 + $0x10] sm:$0xff]  ;;  %v913_v49 = vld [vmem:[%s1054_s4 + $0x18] sm:$0xff] }
 0x17a   :  { %v335_v54 = vmul.f32 0.001953125, %v319_v50  ;;  %v336_v56 = vmul.f32 0.001953125, %v332_v51  ;;  %v918_v50 = vld [vmem:[%s1054_s4 + $0x20] sm:$0xff] }
 0x17c   :  { %v339_v58 = vsub.f32 %v335_v54, %v337_v53  ;;  %v340_v59 = vsub.f32 %v336_v56, %v338_v57  ;;  %v927_v57 = vld [vmem:[%s1054_s4 + $0x28] sm:$0xff] }
 0x17e   :  { %v341_v61 = vadd.f32 1e-05, %v339_v58  ;;  %v807_v62 = vadd.f32 1e-05, %v340_v59  ;;  %v932_v58 = vld [vmem:[%s1054_s4 + $0x30] sm:$0xff]  ;;  %v937_v59 = vld [vmem:[%s1054_s4 + $0x38] sm:$0xff] }
 0x180   :  { %616 = vrsqrt.f32 %v341_v61  ;;  %vm349_vm1 = vweird.f32 %v341_v61  ;;  %vm359_vm3 = vweird.f32 %v807_v62 }
 0x181   :  { %618 = vrsqrt.f32 %v807_v62 }
 0x186   :  { %v617_v63 = vpop.eup %616 }
 0x187   :  { %v810_v0 = vpop.eup %618  ;;  %v344_v2 = vmul.f32 %v617_v63, %v341_v61  ;;  %vm350_vm0 = vweird.f32 %v617_v63 }
 0x188   :  { %v354_v3 = vmul.f32 %v810_v0, %v807_v62  ;;  %vm351_vm2 = vmor %vm349_vm1, %vm350_vm0  ;;  %vm360_vm4 = vweird.f32 %v810_v0 }
 0x189   :  { %v345_v8 = vmul.f32 %v617_v63, %v344_v2  ;;  %vm361_vm13 = vmor %vm359_vm3, %vm360_vm4 }
 0x18a   :  { %v355_v9 = vmul.f32 %v810_v0, %v354_v3 }
 0x18b   :  { %v346_v11 = vmul.f32 0.5, %v345_v8 }
 0x18c   :  { %v356_v14 = vmul.f32 0.5, %v355_v9 }
 0x18d   :  { %v347_v16 = vsub.f32 1.5, %v346_v11 }
 0x18e   :  { %v357_v43 = vsub.f32 1.5, %v356_v14 }
 0x18f   :  { %v348_v5 = vmul.f32 %v617_v63, %v347_v16 }
 0x190   :  { %v358_v4 = vmul.f32 %v810_v0, %v357_v43 }
 0x191   :  { %v352_v37 = vsel %vm351_vm2, %v617_v63, %v348_v5 }
 0x192   :  { %v387_v42 = vmul.f32 %v834_v33, %v352_v37  ;;  %v388_v22 = vmul.f32 %v839_v20, %v352_v37  ;;  %v389_v27 = vmul.f32 %v844_v40, %v352_v37  ;;  %v390_v45 = vmul.f32 %v853_v21, %v352_v37 }
 0x193   :  { %v391_v51 = vmul.f32 %v858_v24, %v352_v37  ;;  %v392_v53 = vmul.f32 %v863_v25, %v352_v37  ;;  %v393_v54 = vmul.f32 %v872_v30, %v352_v37  ;;  %v394_v56 = vmul.f32 %v877_v31, %v352_v37 }
 0x194   :  { %v403_v61 = vmul.f32 %v387_v42, %v363_v1  ;;  %v404_v63 = vmul.f32 %v388_v22, %v364_v10  ;;  %v405_v2 = vmul.f32 %v389_v27, %v365_v7  ;;  %v406_v3 = vmul.f32 %v390_v45, %v366_v12 }
 0x195   :  { %v407_v8 = vmul.f32 %v391_v51, %v367_v13  ;;  %v408_v9 = vmul.f32 %v392_v53, %v368_v15  ;;  %v409_v11 = vmul.f32 %v393_v54, %v369_v19  ;;  %v410_v14 = vmul.f32 %v394_v56, %v370_v26 }
 0x196   :  { %v427_v16 = vadd.f32 %v894_v41, %v403_v61  ;;  %v428_v43 = vadd.f32 %v899_v18, %v404_v63  ;;  %v429_v5 = vadd.f32 %v908_v47, %v405_v2  ;;  %v430_v37 = vadd.f32 %v913_v49, %v406_v3 }
 0x197   :  { %v431_v36 = vadd.f32 %v918_v50, %v407_v8  ;;  %v432_v17 = vadd.f32 %v927_v57, %v408_v9  ;;  %v433_v1 = vadd.f32 %v932_v58, %v409_v11  ;;  %v434_v10 = vadd.f32 %v937_v59, %v410_v14 }
 0x198   :  { %vm443_vm5 = vcmp.gt.f32.partialorder %v427_v16, 0.0  ;;  %vm444_vm6 = vcmp.gt.f32.partialorder %v428_v43, 0.0  ;;  %vm445_vm7 = vcmp.gt.f32.partialorder %v429_v5, 0.0  ;;  %vm446_vm8 = vcmp.gt.f32.partialorder %v430_v37, 0.0 }
 0x199   :  { %vm447_vm9 = vcmp.gt.f32.partialorder %v431_v36, 0.0  ;;  %vm448_vm10 = vcmp.gt.f32.partialorder %v432_v17, 0.0  ;;  %vm449_vm11 = vcmp.gt.f32.partialorder %v433_v1, 0.0  ;;  %vm450_vm12 = vcmp.gt.f32.partialorder %v434_v10, 0.0 }
 0x19a   :  { %v459_v7 = vmul.f32 0.01, %v427_v16  ;;  %v460_v12 = vmul.f32 0.01, %v428_v43  ;;  %v461_v13 = vmul.f32 0.01, %v429_v5  ;;  %v362_v15 = vsel %vm361_vm13, %v810_v0, %v358_v4 }
 0x19b   :  { %v462_v19 = vmul.f32 0.01, %v430_v37  ;;  %v463_v26 = vmul.f32 0.01, %v431_v36  ;;  %v464_v42 = vmul.f32 0.01, %v432_v17  ;;  %v395_v22 = vmul.f32 %v834_v33, %v362_v15 }
 0x19c   :  { %v465_v27 = vmul.f32 0.01, %v433_v1  ;;  %v466_v45 = vmul.f32 0.01, %v434_v10  ;;  %v475_v51 = vsel %vm443_vm5, %v427_v16, %v459_v7  ;;  %v476_v53 = vsel %vm444_vm6, %v428_v43, %v460_v12 }
 0x19d   :  { %v477_v54 = vsel %vm445_vm7, %v429_v5, %v461_v13  ;;  %v478_v62 = vsel %vm446_vm8, %v430_v37, %v462_v19  ;;  %v479_v56 = vsel %vm447_vm9, %v431_v36, %v463_v26  ;;  %v480_v61 = vsel %vm448_vm10, %v432_v17, %v464_v42  ;;  %491 = vst [vmem:[%s1055_s5] sm:$0xff] %v475_v51 }
 0x19e   :  { %v481_v0 = vsel %vm449_vm11, %v433_v1, %v465_v27  ;;  %v482_v33 = vsel %vm450_vm12, %v434_v10, %v466_v45  ;;  %492 = vst [vmem:[%s1055_s5 + $0x8] sm:$0xff] %v476_v53  ;;  %v396_v4 = vmul.f32 %v839_v20, %v362_v15  ;;  %v397_v63 = vmul.f32 %v844_v40, %v362_v15 }
 0x19f   :  { %493 = vst [vmem:[%s1055_s5 + $0x10] sm:$0xff] %v477_v54  ;;  %v398_v17 = vmul.f32 %v853_v21, %v362_v15  ;;  %v399_v36 = vmul.f32 %v858_v24, %v362_v15  ;;  %v400_v2 = vmul.f32 %v863_v25, %v362_v15  ;;  %v401_v3 = vmul.f32 %v872_v30, %v362_v15 }
 0x1a0   :  { %494 = vst [vmem:[%s1055_s5 + $0x18] sm:$0xff] %v478_v62  ;;  %v402_v20 = vmul.f32 %v877_v31, %v362_v15  ;;  %v411_v40 = vmul.f32 %v395_v22, %v371_v55  ;;  %v412_v21 = vmul.f32 %v396_v4, %v372_v48  ;;  %v413_v24 = vmul.f32 %v397_v63, %v373_v6 }
 0x1a1   :  { %495 = vst [vmem:[%s1055_s5 + $0x20] sm:$0xff] %v479_v56  ;;  %v414_v25 = vmul.f32 %v398_v17, %v374_v29  ;;  %v415_v23 = vmul.f32 %v399_v36, %v375_v32  ;;  %v416_v34 = vmul.f32 %v400_v2, %v376_v35  ;;  %v417_v55 = vmul.f32 %v401_v3, %v1056_v38 }
 0x1a2   :  { %496 = vst [vmem:[%s1055_s5 + $0x28] sm:$0xff] %v480_v61  ;;  %v418_v48 = vmul.f32 %v402_v20, %v1057_v52  ;;  %v435_v6 = vadd.f32 %v894_v41, %v411_v40  ;;  %v436_v28 = vadd.f32 %v899_v18, %v412_v21  ;;  %v437_v29 = vadd.f32 %v908_v47, %v413_v24 }
 0x1a3   :  { %497 = vst [vmem:[%s1055_s5 + $0x30] sm:$0xff] %v481_v0  ;;  %v438_v39 = vadd.f32 %v913_v49, %v414_v25  ;;  %v439_v44 = vadd.f32 %v918_v50, %v415_v23  ;;  %v440_v30 = vadd.f32 %v927_v57, %v416_v34  ;;  %v441_v60 = vadd.f32 %v932_v58, %v417_v55 }
 0x1a4   :  { %498 = vst [vmem:[%s1055_s5 + $0x38] sm:$0xff] %v482_v33  ;;  %v442_v46 = vadd.f32 %v937_v59, %v418_v48  ;;  %vm451_vm14 = vcmp.gt.f32.partialorder %v435_v6, 0.0  ;;  %vm452_vm15 = vcmp.gt.f32.partialorder %v436_v28, 0.0  ;;  %vm453_vm0 = vcmp.gt.f32.partialorder %v437_v29, 0.0 }
 0x1a5   :  { %vm454_vm1 = vcmp.gt.f32.partialorder %v438_v39, 0.0  ;;  %vm455_vm2 = vcmp.gt.f32.partialorder %v439_v44, 0.0  ;;  %vm456_vm3 = vcmp.gt.f32.partialorder %v440_v30, 0.0  ;;  %v467_v31 = vmul.f32 0.01, %v435_v6 }
 0x1a6   :  { %v468_v32 = vmul.f32 0.01, %v436_v28  ;;  %v469_v35 = vmul.f32 0.01, %v437_v29  ;;  %v470_v41 = vmul.f32 0.01, %v438_v39 }
 0x1a7   :  { %v471_v18 = vmul.f32 0.01, %v439_v44  ;;  %vm457_vm4 = vcmp.gt.f32.partialorder %v441_v60, 0.0  ;;  %v472_v47 = vmul.f32 0.01, %v440_v30  ;;  %v483_v50 = vsel %vm451_vm14, %v435_v6, %v467_v31 }
 0x1a8   :  { %v473_v49 = vmul.f32 0.01, %v441_v60  ;;  %v474_v57 = vmul.f32 0.01, %v442_v46  ;;  %v484_v8 = vsel %vm452_vm15, %v436_v28, %v468_v32  ;;  %v485_v58 = vsel %vm453_vm0, %v437_v29, %v469_v35  ;;  %499 = vst [vmem:[%s1055_s5 + $0x40] sm:$0xff] %v483_v50 }
 0x1a9   :  { %v486_v9 = vsel %vm454_vm1, %v438_v39, %v470_v41  ;;  %vm458_vm5 = vcmp.gt.f32.partialorder %v442_v46, 0.0  ;;  %v487_v59 = vsel %vm455_vm2, %v439_v44, %v471_v18  ;;  %500 = vst [vmem:[%s1055_s5 + $0x48] sm:$0xff] %v484_v8  ;;  %v488_v11 = vsel %vm456_vm3, %v440_v30, %v472_v47 }
 0x1aa   :  { %501 = vst [vmem:[%s1055_s5 + $0x50] sm:$0xff] %v485_v58  ;;  %v489_v14 = vsel %vm457_vm4, %v441_v60, %v473_v49  ;;  %v490_v16 = vsel %vm458_vm5, %v442_v46, %v474_v57 }
 0x1ab   :  { %502 = vst [vmem:[%s1055_s5 + $0x58] sm:$0xff] %v486_v9 }
 0x1ac   :  { %503 = vst [vmem:[%s1055_s5 + $0x60] sm:$0xff] %v487_v59 }
 0x1ad   :  { %504 = vst [vmem:[%s1055_s5 + $0x68] sm:$0xff] %v488_v11 }
 0x1ae   :  { %505 = vst [vmem:[%s1055_s5 + $0x70] sm:$0xff] %v489_v14 }
 0x1af   :  { %506 = vst [vmem:[%s1055_s5 + $0x78] sm:$0xff] %v490_v16 }

</bundles_post_ra>
